<compile_context>
chip_gen: v7x
topology: tpu7x:2x2x1
jax: 0.10.0
libtpu: 0.0.40
codegen_flags: <defaults>
</compile_context>

<pallas_src>
import functools

import numpy as np

import jax
import jax.numpy as jnp
from jax import lax
from jax.experimental import pallas as pl
from jax.experimental.pallas import tpu as pltpu

CNN_MID = 8   # self.cnn_mid_channel
K = 3         # conv / pool kernel size


def _round_up(a, b):
    return -(-a // b) * b


def _art_kernel(xcol_ref, wconv_ref, wfc_ref, bfc_ref, out_ref, *, conv_w):
    """One batch tile: conv (MXU) -> separable max pool (VPU) -> fused FC (MXU)."""
    # conv: (C*hc*wc, cin*h*w) @ (cin*h*w, Bblk) -> (C*hc*wc, Bblk); batch on lanes.
    conv = jnp.dot(wconv_ref[...], xcol_ref[...],
                   preferred_element_type=jnp.float32)

    def shifted(a, k):          # rows r -> r + k; wrapped rows are zero-weighted below
        return jnp.concatenate([a[k:, :], a[:k, :]], axis=0)

    # 3x3 / stride-1 max pool, separable on the flat row axis:
    #   x-window: row shifts {0, 1, 2};  y-window: row shifts {0, wc, 2*wc}.
    xmax = jnp.maximum(conv, jnp.maximum(shifted(conv, 1), shifted(conv, 2)))
    pooled = jnp.maximum(xmax, jnp.maximum(shifted(xmax, conv_w),
                                           shifted(xmax, 2 * conv_w)))

    # fused FC head (+ fused biases): (OUTp, C*hc*wc) @ (C*hc*wc, Bblk) -> (OUTp, Bblk)
    out_ref[...] = (jnp.dot(wfc_ref[...], pooled,
                            preferred_element_type=jnp.float32) + bfc_ref[...])


def art_forward(x, params, output_dim, *, b_blk=None):
    batch, cin, h, w = x.shape
    hc, wc = h - (K - 1), w - (K - 1)      # conv output spatial
    hp, wp = hc - (K - 1), wc - (K - 1)    # pooled output spatial
    two_fc = output_dim != 1

    # ---- conv as a dense matmul matrix (C*hc*wc, cin*h*w), bias NOT included ----
    sel = jnp.stack([jnp.kron(jnp.eye(hc, h, k=ky, dtype=jnp.float32),
                              jnp.eye(wc, w, k=kx, dtype=jnp.float32))
                     for ky in range(K) for kx in range(K)])          # (9, hc*wc, h*w)
    wconv = params["wconv"].astype(jnp.float32).reshape(CNN_MID, cin, K * K)
    wconv_mat = jnp.einsum("cit,tpq->cpiq", wconv, sel).reshape(
        CNN_MID * hc * wc, cin * h * w)

    # ---- fuse F1 (+ F2) and fold the conv bias into the final bias ----
    if two_fc:
        w_fc = params["w1"].T @ params["w2"].T                        # (288, out)
        b_fc = params["b1"] @ params["w2"].T + params["b2"]           # (out,)
    else:
        w_fc = params["w1"].T                                         # (288, 1)
        b_fc = params["b1"]
    b_eff = b_fc + jnp.repeat(params["bconv"], hp * wp) @ w_fc        # conv bias folded

    # Re-index FC rows from torch flatten order (C, hp, wp) onto the un-cropped conv
    # row grid (C, hc, wc); rows the pool never produces stay zero, so the kernel's
    # wrap-around junk never contributes to the output.
    w_pool = jnp.zeros((CNN_MID, hc, wc, output_dim), jnp.float32)
    w_pool = w_pool.at[:, :hp, :wp, :].set(w_fc.reshape(CNN_MID, hp, wp, output_dim))
    w_pool = w_pool.reshape(CNN_MID * hc * wc, output_dim)

    out_pad = _round_up(output_dim, 8)
    wfc_t = jnp.zeros((out_pad, CNN_MID * hc * wc), jnp.float32)
    wfc_t = wfc_t.at[:output_dim, :].set(w_pool.T)                    # (OUTp, 512)
    bias = jnp.zeros((out_pad, 1), jnp.float32).at[:output_dim, 0].set(b_eff)

    # ---- batch-on-lanes activations, batch padded to a lane-dense block ----
    if b_blk is None:
        b_blk = min(256, _round_up(batch, 128))
    b_total = _round_up(batch, b_blk)
    x_col = x.astype(jnp.float32).reshape(batch, cin * h * w).T       # (cin*h*w, B)
    x_col = jnp.pad(x_col, ((0, 0), (0, b_total - batch)))

    kernel = functools.partial(_art_kernel, conv_w=wc)
    out_t = pl.pallas_call(
        kernel,
        out_shape=jax.ShapeDtypeStruct((out_pad, b_total), jnp.float32),
        grid=(b_total // b_blk,),
        in_specs=[
            pl.BlockSpec((cin * h * w, b_blk), lambda i: (0, i)),              # x tile
            pl.BlockSpec((CNN_MID * hc * wc, cin * h * w), lambda i: (0, 0)),  # conv mat
            pl.BlockSpec((out_pad, CNN_MID * hc * wc), lambda i: (0, 0)),      # fused FC
            pl.BlockSpec((out_pad, 1), lambda i: (0, 0)),                      # fused bias
        ],
        out_specs=pl.BlockSpec((out_pad, b_blk), lambda i: (0, i)),
        compiler_params=pltpu.CompilerParams(dimension_semantics=("parallel",)),
    )(x_col, wconv_mat, wfc_t, bias)

    return out_t[:output_dim, :batch].T                               # (B, out)


def init_params(key, cin, output_dim):
    ks = jax.random.split(key, 6)

    def unif(k, shape, fan_in):
        bound = 1.0 / np.sqrt(fan_in)
        return jax.random.uniform(k, shape, jnp.float32, -bound, bound)

    params = {
        "wconv": unif(ks[0], (CNN_MID, cin, K, K), cin * K * K),
        "bconv": unif(ks[1], (CNN_MID,), cin * K * K),
    }
    if output_dim == 1:
        params["w1"] = unif(ks[2], (1, 288), 288)
        params["b1"] = unif(ks[3], (1,), 288)
    else:
        params["w1"] = unif(ks[2], (32, 288), 288)
        params["b1"] = unif(ks[3], (32,), 288)
        params["w2"] = unif(ks[4], (output_dim, 32), 32)
        params["b2"] = unif(ks[5], (output_dim,), 32)
    return params


def ref_forward(x, params, output_dim):
    """Pure-JAX reference matching the PyTorch forward pass."""
    conv = lax.conv_general_dilated(
        x, params["wconv"], window_strides=(1, 1), padding="VALID",
        dimension_numbers=("NCHW", "OIHW", "NCHW"))
    conv = conv + params["bconv"][None, :, None, None]
    pooled = lax.reduce_window(conv, -jnp.inf, lax.max,
                               (1, 1, K, K), (1, 1, 1, 1), "VALID")
    flat = pooled.reshape(x.shape[0], -1)
    out = flat @ params["w1"].T + params["b1"]
    if output_dim != 1:
        out = out @ params["w2"].T + params["b2"]
    return out


if __name__ == "__main__":
    key = jax.random.PRNGKey(0)
    kx, kp1, kp2 = jax.random.split(key, 3)

    # 10x10 input -> conv 8x8 -> pool 6x6 -> 8*6*6 = 288 (the module's F1 in_features)
    batch, cin, spatial = 2, 4, 10
    x = jax.random.normal(kx, (batch, cin, spatial, spatial), jnp.float32)

    art = jax.jit(art_forward, static_argnums=(2,))

    # multi-class head (F1 -> F2)
    params3 = init_params(kp1, cin, output_dim=3)
    out3 = jax.block_until_ready(art(x, params3, 3))
    np.testing.assert_allclose(np.asarray(out3),
                               np.asarray(ref_forward(x, params3, 3)),
                               rtol=2e-4, atol=2e-4)

    # scalar head (single Linear(288, 1))
    params1 = init_params(kp2, cin, output_dim=1)
    out1 = jax.block_until_ready(art(x, params1, 1))
    np.testing.assert_allclose(np.asarray(out1),
                               np.asarray(ref_forward(x, params1, 1)),
                               rtol=2e-4, atol=2e-4)

    print("KERNEL_OK")
</pallas_src>

<mosaic_0001>
module attributes {stable_mosaic.version = 11 : i64} {
  func.func @_art_kernel(%arg0: i32, %arg1: memref<400x128xf32, #tpu.memory_space<vmem>>, %arg2: memref<512x400xf32, #tpu.memory_space<vmem>>, %arg3: memref<8x512xf32, #tpu.memory_space<vmem>>, %arg4: memref<8x1xf32, #tpu.memory_space<vmem>>, %arg5: memref<8x128xf32, #tpu.memory_space<vmem>>) attributes {dimension_semantics = [#tpu.dimension_semantics<parallel>], iteration_bounds = array<i64: 1>, scalar_prefetch = 0 : i64, scratch_operands = 0 : i64, tpu.core_type = #tpu.core_type<tc>, window_params = [{transform_indices = @transform_0, window_bounds = array<i64: 400, 128>}, {pipeline_mode = #tpu.pipeline_mode<synchronous>, transform_indices = @transform_1, window_bounds = array<i64: 512, 400>}, {pipeline_mode = #tpu.pipeline_mode<synchronous>, transform_indices = @transform_2, window_bounds = array<i64: 8, 512>}, {pipeline_mode = #tpu.pipeline_mode<synchronous>, transform_indices = @transform_3, window_bounds = array<i64: 8, 1>}, {transform_indices = @transform_4, window_bounds = array<i64: 8, 128>}]} {
    %c0 = arith.constant 0 : index
    %c0_0 = arith.constant 0 : index
    %0 = vector.load %arg2[%c0, %c0_0] : memref<512x400xf32, #tpu.memory_space<vmem>>, vector<512x400xf32>
    %c0_1 = arith.constant 0 : index
    %c0_2 = arith.constant 0 : index
    %1 = vector.load %arg1[%c0_1, %c0_2] : memref<400x128xf32, #tpu.memory_space<vmem>>, vector<400x128xf32>
    %cst = arith.constant dense<0.000000e+00> : vector<512x128xf32>
    %2 = tpu.matmul %0, %1, %cst {dimension_numbers = #tpu.dot_dimension_numbers<[1], [0], [0], [1], [0, 0, 1, 1], [], []>} : vector<512x400xf32>, vector<400x128xf32>, vector<512x128xf32> -> vector<512x128xf32>
    %3 = vector.extract_strided_slice %2 {offsets = [1, 0], sizes = [511, 128], strides = [1, 1]} : vector<512x128xf32> to vector<511x128xf32>
    %4 = vector.extract_strided_slice %2 {offsets = [0, 0], sizes = [1, 128], strides = [1, 1]} : vector<512x128xf32> to vector<1x128xf32>
    %5 = tpu.concatenate %3, %4 in 0 : vector<511x128xf32>, vector<1x128xf32> -> vector<512x128xf32>
    %6 = vector.extract_strided_slice %2 {offsets = [2, 0], sizes = [510, 128], strides = [1, 1]} : vector<512x128xf32> to vector<510x128xf32>
    %7 = vector.extract_strided_slice %2 {offsets = [0, 0], sizes = [2, 128], strides = [1, 1]} : vector<512x128xf32> to vector<2x128xf32>
    %8 = tpu.concatenate %6, %7 in 0 : vector<510x128xf32>, vector<2x128xf32> -> vector<512x128xf32>
    %9 = arith.maximumf %5, %8 : vector<512x128xf32>
    %10 = arith.maximumf %2, %9 : vector<512x128xf32>
    %11 = vector.extract_strided_slice %10 {offsets = [8, 0], sizes = [504, 128], strides = [1, 1]} : vector<512x128xf32> to vector<504x128xf32>
    %12 = vector.extract_strided_slice %10 {offsets = [0, 0], sizes = [8, 128], strides = [1, 1]} : vector<512x128xf32> to vector<8x128xf32>
    %13 = tpu.concatenate %11, %12 in 0 : vector<504x128xf32>, vector<8x128xf32> -> vector<512x128xf32>
    %14 = vector.extract_strided_slice %10 {offsets = [16, 0], sizes = [496, 128], strides = [1, 1]} : vector<512x128xf32> to vector<496x128xf32>
    %15 = vector.extract_strided_slice %10 {offsets = [0, 0], sizes = [16, 128], strides = [1, 1]} : vector<512x128xf32> to vector<16x128xf32>
    %16 = tpu.concatenate %14, %15 in 0 : vector<496x128xf32>, vector<16x128xf32> -> vector<512x128xf32>
    %17 = arith.maximumf %13, %16 : vector<512x128xf32>
    %18 = arith.maximumf %10, %17 : vector<512x128xf32>
    %c0_3 = arith.constant 0 : index
    %c0_4 = arith.constant 0 : index
    %19 = vector.load %arg3[%c0_3, %c0_4] : memref<8x512xf32, #tpu.memory_space<vmem>>, vector<8x512xf32>
    %cst_5 = arith.constant dense<0.000000e+00> : vector<8x128xf32>
    %20 = tpu.matmul %19, %18, %cst_5 {dimension_numbers = #tpu.dot_dimension_numbers<[1], [0], [0], [1], [0, 0, 1, 1], [], []>} : vector<8x512xf32>, vector<512x128xf32>, vector<8x128xf32> -> vector<8x128xf32>
    %c0_6 = arith.constant 0 : index
    %c0_7 = arith.constant 0 : index
    %21 = vector.load %arg4[%c0_6, %c0_7] : memref<8x1xf32, #tpu.memory_space<vmem>>, vector<8x1xf32>
    %22 = vector.broadcast %21 : vector<8x1xf32> to vector<8x128xf32>
    %23 = arith.addf %20, %22 : vector<8x128xf32>
    %c0_8 = arith.constant 0 : index
    %c0_9 = arith.constant 0 : index
    %24 = vector.load %arg5[%c0_8, %c0_9] : memref<8x128xf32, #tpu.memory_space<vmem>>, vector<8x128xf32>
    tpu.vector_store %arg5[%c0_8, %c0_9], %23 {strides = array<i32>} : memref<8x128xf32, #tpu.memory_space<vmem>>, vector<8x128xf32>,
    return
  }
  func.func @transform_0(%arg0: i32) -> (i32, i32) {
    %c0_i32 = arith.constant 0 : i32
    %c0_i32_0 = arith.constant 0 : i32
    return %c0_i32, %arg0 : i32, i32
  }
  func.func @transform_1(%arg0: i32) -> (i32, i32) {
    %c0_i32 = arith.constant 0 : i32
    %c0_i32_0 = arith.constant 0 : i32
    %c0_i32_1 = arith.constant 0 : i32
    return %c0_i32, %c0_i32_0 : i32, i32
  }
  func.func @transform_2(%arg0: i32) -> (i32, i32) {
    %c0_i32 = arith.constant 0 : i32
    %c0_i32_0 = arith.constant 0 : i32
    %c0_i32_1 = arith.constant 0 : i32
    return %c0_i32, %c0_i32_0 : i32, i32
  }
  func.func @transform_3(%arg0: i32) -> (i32, i32) {
    %c0_i32 = arith.constant 0 : i32
    %c0_i32_0 = arith.constant 0 : i32
    %c0_i32_1 = arith.constant 0 : i32
    return %c0_i32, %c0_i32_0 : i32, i32
  }
  func.func @transform_4(%arg0: i32) -> (i32, i32) {
    %c0_i32 = arith.constant 0 : i32
    %c0_i32_0 = arith.constant 0 : i32
    return %c0_i32, %arg0 : i32, i32
  }
}

</mosaic_0001>

<bundles_post_ra>
// kernel: art_forward.1
= control target key start
LH: loop header
LB: loop body
LE: loop exit
PB: predicated region body
PF: predicated region fallthrough
CT: control target
= control target key end

     0   :  { %v2508_v0 = vmov 0.0|0.0   ;;  %vm323_vm0 = vcmask 130048   ;;  %vm1350_vm1 = vcmask 1046528   ;;  %vm1544_vm2 = vcmask 1045504   ;;  %s4194_s0 = inlined_call_operand.vmem [shape: f32[400,128], index: 0, kind: input, shape index: {}]   ;;  %s4195_s1 = inlined_call_operand.vmem [shape: f32[512,400], index: 1, kind: input, shape index: {}]   ;;  %s4196_s2 = inlined_call_operand.vmem [shape: f32[8,512], index: 2, kind: input, shape index: {}]   ;;  %s4197_s3 = inlined_call_operand.vmem [shape: f32[8,1], index: 3, kind: input, shape index: {}]   ;;  %s4198_s4 = inlined_call_operand.vmem [shape: f32[8,128], index: 4, kind: output, shape index: {}]  }
   0x1   :  { %2283 = vmatprep.subr.bf16.mxu0 %v2508_v0  ;;  %v273_v1 = vld [vmem:[%s4194_s0] sm:$0xff]  ;;  %v274_v2 = vld [vmem:[%s4194_s0 + $0x8] sm:$0xff]  ;;  %v275_v3 = vld [vmem:[%s4194_s0 + $0x10] sm:$0xff]  ;;  %2422 = vmatprep.subr.bf16.mxu1 %v2508_v0 }
   0x2   :  { %v2284_v4 = vpack.c.bf16 %v274_v2, %v273_v1  ;;  %v276_v5 = vld [vmem:[%s4194_s0 + $0x18] sm:$0xff]  ;;  %v277_v7 = vld [vmem:[%s4194_s0 + $0x20] sm:$0xff]  ;;  %v278_v8 = vld [vmem:[%s4194_s0 + $0x28] sm:$0xff] }
   0x3   :  { %v2287_v6 = vpack.c.bf16 %v276_v5, %v275_v3  ;;  %v305_v9 = vld [vmem:[%s4194_s0 + $0x100] sm:$0xff]  ;;  %v306_v10 = vld [vmem:[%s4194_s0 + $0x108] sm:$0xff]  ;;  %v2290_v11 = vpack.c.bf16 %v278_v8, %v277_v7  ;;  %v307_v13 = vld [vmem:[%s4194_s0 + $0x110] sm:$0xff] }
   0x4   :  { %2285 = vmatpush1.bf16.msra.mxu0 %v2284_v4  ;;  %v2562_v12 = vpack.c.bf16 %v306_v10, %v305_v9  ;;  %v308_v14 = vld [vmem:[%s4194_s0 + $0x118] sm:$0xff]  ;;  %v279_v15 = vld [vmem:[%s4194_s0 + $0x30] sm:$0xff]  ;;  %v309_v18 = vld [vmem:[%s4194_s0 + $0x120] sm:$0xff] }
   0x5   :  { %2286 = vmatprep.subr.bf16.mxu0 %v2508_v0  ;;  %v280_v16 = vld [vmem:[%s4194_s0 + $0x38] sm:$0xff]  ;;  %v2578_v17 = vpack.c.bf16 %v308_v14, %v307_v13  ;;  %v310_v19 = vld [vmem:[%s4194_s0 + $0x128] sm:$0xff]  ;;  %v281_v21 = vld [vmem:[%s4194_s0 + $0x40] sm:$0xff] }
   0x6   :  { %2431 = vmatpush1.bf16.msra.mxu1 %v2562_v12  ;;  %v2293_v20 = vpack.c.bf16 %v280_v16, %v279_v15  ;;  %v282_v22 = vld [vmem:[%s4194_s0 + $0x48] sm:$0xff]  ;;  %v2595_v23 = vpack.c.bf16 %v310_v19, %v309_v18  ;;  %v311_v24 = vld [vmem:[%s4194_s0 + $0x130] sm:$0xff]  ;;  %v312_v25 = vld [vmem:[%s4194_s0 + $0x138] sm:$0xff] }
   0x7   :  { %2423 = vmatprep.subr.bf16.mxu1 %v2508_v0  ;;  %v2296_v26 = vpack.c.bf16 %v282_v22, %v281_v21  ;;  %v283_v27 = vld [vmem:[%s4194_s0 + $0x50] sm:$0xff]  ;;  %v284_v28 = vld [vmem:[%s4194_s0 + $0x58] sm:$0xff]  ;;  %v18_v29 = vld [vmem:[%s4195_s1 + $0x8] sm:$0xff]  ;;  %v2615_v30 = vpack.c.bf16 %v312_v25, %v311_v24 }
   0x8   :  { %2288 = vmatpush1.bf16.msra.mxu0 %v2287_v6  ;;  %580 = vmatprep.mubr.f32.mxu0 %v18_v29  ;;  %v24_v31 = vld [vmem:[%s4195_s1 + $0x38] sm:$0xff]  ;;  %v313_v32 = vld [vmem:[%s4194_s0 + $0x140] sm:$0xff]  ;;  %v314_v33 = vld [vmem:[%s4194_s0 + $0x148] sm:$0xff]  ;;  %v2299_v34 = vpack.c.bf16 %v284_v28, %v283_v27 }
   0x9   :  { %2289 = vmatprep.subr.bf16.mxu0 %v2508_v0  ;;  %2150 = vmatprep.mubr.msk.f32.mxu1 %vm323_vm0, %v24_v31  ;;  %v285_v35 = vld [vmem:[%s4194_s0 + $0x60] sm:$0xff]  ;;  %v286_v36 = vld [vmem:[%s4194_s0 + $0x68] sm:$0xff]  ;;  %v2636_v37 = vpack.c.bf16 %v314_v33, %v313_v32  ;;  %v315_v38 = vld [vmem:[%s4194_s0 + $0x150] sm:$0xff] }
   0xa   :  { %2432 = vmatpush1.bf16.msra.mxu1 %v2578_v17  ;;  %v316_v39 = vld [vmem:[%s4194_s0 + $0x158] sm:$0xff]  ;;  %v2302_v40 = vpack.c.bf16 %v286_v36, %v285_v35  ;;  %v287_v41 = vld [vmem:[%s4194_s0 + $0x70] sm:$0xff]  ;;  %v317_v44 = vld [vmem:[%s4194_s0 + $0x160] sm:$0xff] }
   0xb   :  { %2424 = vmatprep.subr.bf16.mxu1 %v2508_v0  ;;  %v288_v42 = vld [vmem:[%s4194_s0 + $0x78] sm:$0xff]  ;;  %v2653_v43 = vpack.c.bf16 %v316_v39, %v315_v38  ;;  %v318_v45 = vld [vmem:[%s4194_s0 + $0x168] sm:$0xff]  ;;  %v289_v47 = vld [vmem:[%s4194_s0 + $0x80] sm:$0xff] }
   0xc   :  { %2291 = vmatpush1.bf16.msra.mxu0 %v2290_v11  ;;  %v2305_v46 = vpack.c.bf16 %v288_v42, %v287_v41  ;;  %v290_v48 = vld [vmem:[%s4194_s0 + $0x88] sm:$0xff]  ;;  %v2670_v49 = vpack.c.bf16 %v318_v45, %v317_v44  ;;  %v319_v50 = vld [vmem:[%s4194_s0 + $0x170] sm:$0xff]  ;;  %v320_v51 = vld [vmem:[%s4194_s0 + $0x178] sm:$0xff] }
   0xd   :  { %2292 = vmatprep.subr.bf16.mxu0 %v2508_v0  ;;  %v2308_v52 = vpack.c.bf16 %v290_v48, %v289_v47  ;;  %v291_v53 = vld [vmem:[%s4194_s0 + $0x90] sm:$0xff]  ;;  %v292_v54 = vld [vmem:[%s4194_s0 + $0x98] sm:$0xff]  ;;  %v2687_v55 = vpack.c.bf16 %v320_v51, %v319_v50  ;;  %v321_v56 = vld [vmem:[%s4194_s0 + $0x180] sm:$0xff] }
   0xe   :  { %2433 = vmatpush1.bf16.msra.mxu1 %v2595_v23  ;;  %v322_v57 = vld [vmem:[%s4194_s0 + $0x188] sm:$0xff]  ;;  %v2311_v58 = vpack.c.bf16 %v292_v54, %v291_v53  ;;  %v293_v59 = vld [vmem:[%s4194_s0 + $0xa0] sm:$0xff]  ;;  %v295_v63 = vld [vmem:[%s4194_s0 + $0xb0] sm:$0xff] }
   0xf   :  { %2425 = vmatprep.subr.bf16.mxu1 %v2508_v0  ;;  %v294_v60 = vld [vmem:[%s4194_s0 + $0xa8] sm:$0xff]  ;;  %v2704_v61 = vpack.c.bf16 %v322_v57, %v321_v56  ;;  %v296_v1 = vld [vmem:[%s4194_s0 + $0xb8] sm:$0xff]  ;;  %v23_v2 = vld [vmem:[%s4195_s1 + $0x30] sm:$0xff] }
  0x10   :  { %2294 = vmatpush1.bf16.msra.mxu0 %v2293_v20  ;;  %v2314_v62 = vpack.c.bf16 %v294_v60, %v293_v59  ;;  %v28_v3 = vld [vmem:[%s4195_s1 + $0x58] sm:$0xff]  ;;  %v2317_v4 = vpack.c.bf16 %v296_v1, %v295_v63  ;;  %v297_v5 = vld [vmem:[%s4194_s0 + $0xc0] sm:$0xff]  ;;  %v298_v6 = vld [vmem:[%s4194_s0 + $0xc8] sm:$0xff] }
  0x11   :  { %2295 = vmatprep.subr.bf16.mxu0 %v2508_v0  ;;  %v27_v7 = vld [vmem:[%s4195_s1 + $0x50] sm:$0xff]  ;;  %v32_v8 = vld [vmem:[%s4195_s1 + $0x78] sm:$0xff]  ;;  %v2320_v9 = vpack.c.bf16 %v298_v6, %v297_v5  ;;  %v301_v16 = vld [vmem:[%s4194_s0 + $0xe0] sm:$0xff] }
  0x12   :  { %2434 = vmatpush1.bf16.msra.mxu1 %v2615_v30  ;;  %v299_v10 = vld [vmem:[%s4194_s0 + $0xd0] sm:$0xff]  ;;  %v300_v11 = vld [vmem:[%s4194_s0 + $0xd8] sm:$0xff]  ;;  %v302_v18 = vld [vmem:[%s4194_s0 + $0xe8] sm:$0xff] }
  0x13   :  { %2426 = vmatprep.subr.bf16.mxu1 %v2508_v0  ;;  %v31_v13 = vld [vmem:[%s4195_s1 + $0x70] sm:$0xff]  ;;  %v36_v14 = vld [vmem:[%s4195_s1 + $0x98] sm:$0xff]  ;;  %v2323_v15 = vpack.c.bf16 %v300_v11, %v299_v10  ;;  %v2326_v21 = vpack.c.bf16 %v302_v18, %v301_v16  ;;  %v17_v31 = vld [vmem:[%s4195_s1] sm:$0xff] }
  0x14   :  { %2297 = vmatpush1.bf16.msra.mxu0 %v2296_v26  ;;  %v35_v19 = vld [vmem:[%s4195_s1 + $0x90] sm:$0xff]  ;;  %v40_v20 = vld [vmem:[%s4195_s1 + $0xb8] sm:$0xff]  ;;  %v22_v32 = vld [vmem:[%s4195_s1 + $0x28] sm:$0xff] }
  0x15   :  { %2298 = vmatprep.subr.bf16.mxu0 %v2508_v0  ;;  %v303_v22 = vld [vmem:[%s4194_s0 + $0xf0] sm:$0xff]  ;;  %v304_v24 = vld [vmem:[%s4194_s0 + $0xf8] sm:$0xff]  ;;  %v21_v35 = vld [vmem:[%s4195_s1 + $0x20] sm:$0xff] }
  0x16   :  { %2435 = vmatpush1.bf16.msra.mxu1 %v2636_v37  ;;  %v39_v25 = vld [vmem:[%s4195_s1 + $0xb0] sm:$0xff]  ;;  %v44_v26 = vld [vmem:[%s4195_s1 + $0xd8] sm:$0xff]  ;;  %v2329_v27 = vpack.c.bf16 %v304_v24, %v303_v22  ;;  %v26_v36 = vld [vmem:[%s4195_s1 + $0x48] sm:$0xff] }
  0x17   :  { %2427 = vmatprep.subr.bf16.mxu1 %v2508_v0  ;;  %v43_v28 = vld [vmem:[%s4195_s1 + $0xd0] sm:$0xff]  ;;  %v48_v29 = vld [vmem:[%s4195_s1 + $0xf8] sm:$0xff]  ;;  %v34_v44 = vld [vmem:[%s4195_s1 + $0x88] sm:$0xff] }
  0x18   :  { %2300 = vmatpush1.bf16.msra.mxu0 %v2299_v34  ;;  %v47_v33 = vld [vmem:[%s4195_s1 + $0xf0] sm:$0xff]  ;;  %v52_v34 = vld [vmem:[%s4195_s1 + $0x118] sm:$0xff]  ;;  %v38_v47 = vld [vmem:[%s4195_s1 + $0xa8] sm:$0xff] }
  0x19   :  { %2301 = vmatprep.subr.bf16.mxu0 %v2508_v0  ;;  %v51_v38 = vld [vmem:[%s4195_s1 + $0x110] sm:$0xff]  ;;  %v56_v39 = vld [vmem:[%s4195_s1 + $0x138] sm:$0xff]  ;;  %v42_v51 = vld [vmem:[%s4195_s1 + $0xc8] sm:$0xff] }
  0x1a   :  { %2436 = vmatpush1.bf16.msra.mxu1 %v2653_v43  ;;  %v55_v41 = vld [vmem:[%s4195_s1 + $0x130] sm:$0xff]  ;;  %v60_v42 = vld [vmem:[%s4195_s1 + $0x158] sm:$0xff]  ;;  %v46_v54 = vld [vmem:[%s4195_s1 + $0xe8] sm:$0xff] }
  0x1b   :  { %2428 = vmatprep.subr.bf16.mxu1 %v2508_v0  ;;  %v59_v45 = vld [vmem:[%s4195_s1 + $0x150] sm:$0xff]  ;;  %v68_v50 = vld [vmem:[%s4195_s1 + $0x198] sm:$0xff]  ;;  %v65_v11 = vld [vmem:[%s4195_s1 + $0x180] sm:$0xff] }
  0x1c   :  { %2303 = vmatpush1.bf16.msra.mxu0 %v2302_v40  ;;  %v30_v40 = vld [vmem:[%s4195_s1 + $0x68] sm:$0xff]  ;;  %v63_v48 = vld [vmem:[%s4195_s1 + $0x170] sm:$0xff]  ;;  %v72_v53 = vld [vmem:[%s4195_s1 + $0x1b8] sm:$0xff] }
  0x1d   :  { %2304 = vmatprep.subr.bf16.mxu0 %v2508_v0  ;;  %v71_v56 = vld [vmem:[%s4195_s1 + $0x1b0] sm:$0xff]  ;;  %v76_v57 = vld [vmem:[%s4195_s1 + $0x1d8] sm:$0xff]  ;;  %v69_v16 = vld [vmem:[%s4195_s1 + $0x1a0] sm:$0xff] }
  0x1e   :  { %2437 = vmatpush1.bf16.msra.mxu1 %v2670_v49  ;;  %v75_v59 = vld [vmem:[%s4195_s1 + $0x1d0] sm:$0xff]  ;;  %v80_v60 = vld [vmem:[%s4195_s1 + $0x1f8] sm:$0xff]  ;;  %v74_v18 = vld [vmem:[%s4195_s1 + $0x1c8] sm:$0xff] }
  0x1f   :  { %2429 = vmatprep.subr.bf16.mxu1 %v2508_v0  ;;  %v79_v63 = vld [vmem:[%s4195_s1 + $0x1f0] sm:$0xff]  ;;  %v84_v1 = vld [vmem:[%s4195_s1 + $0x218] sm:$0xff]  ;;  %v78_v22 = vld [vmem:[%s4195_s1 + $0x1e8] sm:$0xff] }
  0x20   :  { %2306 = vmatpush1.bf16.msra.mxu0 %v2305_v46  ;;  %v64_v46 = vld [vmem:[%s4195_s1 + $0x178] sm:$0xff]  ;;  %v87_v5 = vld [vmem:[%s4195_s1 + $0x230] sm:$0xff] }
  0x21   :  { %2307 = vmatprep.subr.bf16.mxu0 %v2508_v0  ;;  %v92_v6 = vld [vmem:[%s4195_s1 + $0x258] sm:$0xff]  ;;  %v103_v24 = vld [vmem:[%s4195_s1 + $0x2b0] sm:$0xff] }
  0x22   :  { %2438 = vmatpush1.bf16.msra.mxu1 %v2687_v55  ;;  %v96_v10 = vld [vmem:[%s4195_s1 + $0x278] sm:$0xff] }
  0x23   :  { %2430 = vmatprep.subr.bf16.mxu1 %v2508_v0 }
  0x24   :  { %2309 = vmatpush1.bf16.msra.mxu0 %v2308_v52  ;;  %v67_v52 = vld [vmem:[%s4195_s1 + $0x190] sm:$0xff] }
  0x25   :  { %2310 = vmatprep.subr.bf16.mxu0 %v2508_v0 }
  0x26   :  { %2439 = vmatpush1.bf16.msra.mxu1 %v2704_v61 }
  0x28   :  { %2312 = vmatpush1.bf16.msra.mxu0 %v2311_v58  ;;  %v50_v58 = vld [vmem:[%s4195_s1 + $0x108] sm:$0xff] }
  0x29   :  { %2313 = vmatprep.subr.bf16.mxu0 %v2508_v0  ;;  %971 = vmatmul.mubr.f32.vlgmr.msra.gmra.mrb[0].mxu1 %v23_v2  ;;  %v83_v2 = vld [vmem:[%s4195_s1 + $0x210] sm:$0xff] }
  0x2a   :  { %2151 = vmatprep.mubr.msk.f32.mxu1 %vm323_vm0, %v28_v3  ;;  %v88_v3 = vld [vmem:[%s4195_s1 + $0x238] sm:$0xff] }
  0x2c   :  { %2315 = vmatpush1.bf16.msra.mxu0 %v2314_v62  ;;  %v54_v62 = vld [vmem:[%s4195_s1 + $0x128] sm:$0xff] }
  0x2d   :  { %2316 = vmatprep.subr.bf16.mxu0 %v2508_v0  ;;  %976 = vmatmul.mubr.f32.gmra.mrb[2].mxu1 %v27_v7  ;;  %v61_v7 = vld [vmem:[%s4195_s1 + $0x160] sm:$0xff] }
  0x2e   :  { %2152 = vmatprep.mubr.msk.f32.mxu1 %vm323_vm0, %v32_v8  ;;  %v66_v8 = vld [vmem:[%s4195_s1 + $0x188] sm:$0xff] }
  0x30   :  { %2318 = vmatpush1.bf16.msra.mxu0 %v2317_v4  ;;  %v62_v4 = vld [vmem:[%s4195_s1 + $0x168] sm:$0xff] }
  0x31   :  { %2319 = vmatprep.subr.bf16.mxu0 %v2508_v0  ;;  %981 = vmatmul.mubr.f32.gmra.mrb[4].mxu1 %v31_v13  ;;  %v70_v13 = vld [vmem:[%s4195_s1 + $0x1a8] sm:$0xff] }
  0x32   :  { %2153 = vmatprep.mubr.msk.f32.mxu1 %vm323_vm0, %v36_v14  ;;  %v95_v14 = vld [vmem:[%s4195_s1 + $0x270] sm:$0xff] }
  0x34   :  { %2321 = vmatpush1.bf16.msra.mxu0 %v2320_v9  ;;  %v91_v9 = vld [vmem:[%s4195_s1 + $0x250] sm:$0xff] }
  0x35   :  { %2322 = vmatprep.subr.bf16.mxu0 %v2508_v0  ;;  %986 = vmatmul.mubr.f32.gmra.mrb[6].mxu1 %v35_v19  ;;  %v99_v19 = vld [vmem:[%s4195_s1 + $0x290] sm:$0xff] }
  0x36   :  { %2154 = vmatprep.mubr.msk.f32.mxu1 %vm323_vm0, %v40_v20  ;;  %v104_v20 = vld [vmem:[%s4195_s1 + $0x2b8] sm:$0xff] }
  0x38   :  { %2324 = vmatpush1.bf16.msra.mxu0 %v2323_v15  ;;  %v100_v15 = vld [vmem:[%s4195_s1 + $0x298] sm:$0xff] }
  0x39   :  { %2325 = vmatprep.subr.bf16.mxu0 %v2508_v0  ;;  %991 = vmatmul.mubr.f32.gmra.mrb[8].mxu1 %v39_v25  ;;  %v108_v25 = vld [vmem:[%s4195_s1 + $0x2d8] sm:$0xff] }
  0x3a   :  { %2155 = vmatprep.mubr.msk.f32.mxu1 %vm323_vm0, %v44_v26  ;;  %v77_v26 = vld [vmem:[%s4195_s1 + $0x1e0] sm:$0xff] }
  0x3c   :  { %2327 = vmatpush1.bf16.msra.mxu0 %v2326_v21  ;;  %v73_v21 = vld [vmem:[%s4195_s1 + $0x1c0] sm:$0xff] }
  0x3d   :  { %2328 = vmatprep.subr.bf16.mxu0 %v2508_v0  ;;  %996 = vmatmul.mubr.f32.gmra.mrb[10].mxu1 %v43_v28  ;;  %v107_v28 = vld [vmem:[%s4195_s1 + $0x2d0] sm:$0xff] }
  0x3e   :  { %2156 = vmatprep.mubr.msk.f32.mxu1 %vm323_vm0, %v48_v29  ;;  %v112_v29 = vld [vmem:[%s4195_s1 + $0x2f8] sm:$0xff] }
  0x40   :  { %2330 = vmatpush1.bf16.msra.mxu0 %v2329_v27  ;;  %v82_v27 = vld [vmem:[%s4195_s1 + $0x208] sm:$0xff] }
  0x41   :  { %2331 = vmatprep.subr.bf16.mxu0 %v2508_v0  ;;  %1001 = vmatmul.mubr.f32.gmra.mrb[12].mxu1 %v47_v33  ;;  %v111_v33 = vld [vmem:[%s4195_s1 + $0x2f0] sm:$0xff] }
  0x42   :  { %2157 = vmatprep.mubr.msk.f32.mxu1 %vm323_vm0, %v52_v34  ;;  %v116_v34 = vld [vmem:[%s4195_s1 + $0x318] sm:$0xff] }
  0x43   :  { %581 = vmatmul.mubr.f32.vlgmr.msra.gmra.mrb[0].mxu0 %v17_v31  ;;  %v81_v31 = vld [vmem:[%s4195_s1 + $0x200] sm:$0xff] }
  0x44   :  { %585 = vmatprep.mubr.f32.mxu0 %v22_v32  ;;  %2333 = vmatpush1.bf16.msra.mxu0 %v2562_v12  ;;  %v25_v12 = vld [vmem:[%s4195_s1 + $0x40] sm:$0xff]  ;;  %v86_v32 = vld [vmem:[%s4195_s1 + $0x228] sm:$0xff] }
  0x45   :  { %2334 = vmatprep.subr.bf16.mxu0 %v2508_v0  ;;  %1006 = vmatmul.mubr.f32.gmra.mrb[14].mxu1 %v51_v38  ;;  %v115_v38 = vld [vmem:[%s4195_s1 + $0x310] sm:$0xff] }
  0x46   :  { %2158 = vmatprep.mubr.msk.f32.mxu1 %vm323_vm0, %v56_v39  ;;  %v120_v39 = vld [vmem:[%s4195_s1 + $0x338] sm:$0xff] }
  0x47   :  { %586 = vmatmul.mubr.f32.gmra.mrb[2].mxu0 %v21_v35  ;;  %v85_v35 = vld [vmem:[%s4195_s1 + $0x220] sm:$0xff] }
  0x48   :  { %590 = vmatprep.mubr.f32.mxu0 %v26_v36  ;;  %2336 = vmatpush1.bf16.msra.mxu0 %v2578_v17  ;;  %v29_v17 = vld [vmem:[%s4195_s1 + $0x60] sm:$0xff]  ;;  %v90_v36 = vld [vmem:[%s4195_s1 + $0x248] sm:$0xff] }
  0x49   :  { %2337 = vmatprep.subr.bf16.mxu0 %v2508_v0  ;;  %1011 = vmatmul.mubr.f32.gmra.mrb[16].mxu1 %v55_v41  ;;  %v119_v41 = vld [vmem:[%s4195_s1 + $0x330] sm:$0xff] }
  0x4a   :  { %2159 = vmatprep.mubr.msk.f32.mxu1 %vm323_vm0, %v60_v42  ;;  %v124_v42 = vld [vmem:[%s4195_s1 + $0x358] sm:$0xff] }
  0x4b   :  { %591 = vmatmul.mubr.f32.gmra.mrb[4].mxu0 %v25_v12  ;;  %v89_v12 = vld [vmem:[%s4195_s1 + $0x240] sm:$0xff] }
  0x4c   :  { %595 = vmatprep.mubr.f32.mxu0 %v30_v40  ;;  %2339 = vmatpush1.bf16.msra.mxu0 %v2595_v23  ;;  %v33_v23 = vld [vmem:[%s4195_s1 + $0x80] sm:$0xff]  ;;  %v94_v40 = vld [vmem:[%s4195_s1 + $0x268] sm:$0xff] }
  0x4d   :  { %2340 = vmatprep.subr.bf16.mxu0 %v2508_v0  ;;  %1016 = vmatmul.mubr.f32.gmra.mrb[18].mxu1 %v59_v45  ;;  %v123_v45 = vld [vmem:[%s4195_s1 + $0x350] sm:$0xff] }
  0x4e   :  { %2160 = vmatprep.mubr.msk.f32.mxu1 %vm323_vm0, %v64_v46  ;;  %v128_v46 = vld [vmem:[%s4195_s1 + $0x378] sm:$0xff] }
  0x4f   :  { %596 = vmatmul.mubr.f32.gmra.mrb[6].mxu0 %v29_v17  ;;  %v93_v17 = vld [vmem:[%s4195_s1 + $0x260] sm:$0xff] }
  0x50   :  { %600 = vmatprep.mubr.f32.mxu0 %v34_v44  ;;  %2342 = vmatpush1.bf16.msra.mxu0 %v2615_v30  ;;  %v37_v30 = vld [vmem:[%s4195_s1 + $0xa0] sm:$0xff]  ;;  %v98_v44 = vld [vmem:[%s4195_s1 + $0x288] sm:$0xff] }
  0x51   :  { %2343 = vmatprep.subr.bf16.mxu0 %v2508_v0  ;;  %1021 = vmatmul.mubr.f32.gmra.mrb[20].mxu1 %v63_v48  ;;  %v127_v48 = vld [vmem:[%s4195_s1 + $0x370] sm:$0xff] }
  0x52   :  { %2161 = vmatprep.mubr.msk.f32.mxu1 %vm323_vm0, %v68_v50  ;;  %v132_v50 = vld [vmem:[%s4195_s1 + $0x398] sm:$0xff] }
  0x53   :  { %601 = vmatmul.mubr.f32.gmra.mrb[8].mxu0 %v33_v23  ;;  %v97_v23 = vld [vmem:[%s4195_s1 + $0x280] sm:$0xff] }
  0x54   :  { %605 = vmatprep.mubr.f32.mxu0 %v38_v47  ;;  %2345 = vmatpush1.bf16.msra.mxu0 %v2636_v37  ;;  %v41_v37 = vld [vmem:[%s4195_s1 + $0xc0] sm:$0xff]  ;;  %v102_v47 = vld [vmem:[%s4195_s1 + $0x2a8] sm:$0xff] }
  0x55   :  { %2346 = vmatprep.subr.bf16.mxu0 %v2508_v0  ;;  %1026 = vmatmul.mubr.f32.gmra.mrb[22].mxu1 %v67_v52  ;;  %v131_v52 = vld [vmem:[%s4195_s1 + $0x390] sm:$0xff] }
  0x56   :  { %2162 = vmatprep.mubr.msk.f32.mxu1 %vm323_vm0, %v72_v53  ;;  %v136_v53 = vld [vmem:[%s4195_s1 + $0x3b8] sm:$0xff] }
  0x57   :  { %606 = vmatmul.mubr.f32.gmra.mrb[10].mxu0 %v37_v30  ;;  %v101_v30 = vld [vmem:[%s4195_s1 + $0x2a0] sm:$0xff] }
  0x58   :  { %610 = vmatprep.mubr.f32.mxu0 %v42_v51  ;;  %2348 = vmatpush1.bf16.msra.mxu0 %v2653_v43  ;;  %v45_v43 = vld [vmem:[%s4195_s1 + $0xe0] sm:$0xff]  ;;  %v106_v51 = vld [vmem:[%s4195_s1 + $0x2c8] sm:$0xff] }
  0x59   :  { %2349 = vmatprep.subr.bf16.mxu0 %v2508_v0  ;;  %1031 = vmatmul.mubr.f32.gmra.mrb[24].mxu1 %v71_v56  ;;  %v135_v56 = vld [vmem:[%s4195_s1 + $0x3b0] sm:$0xff] }
  0x5a   :  { %2163 = vmatprep.mubr.msk.f32.mxu1 %vm323_vm0, %v76_v57  ;;  %v140_v57 = vld [vmem:[%s4195_s1 + $0x3d8] sm:$0xff] }
  0x5b   :  { %611 = vmatmul.mubr.f32.gmra.mrb[12].mxu0 %v41_v37  ;;  %v105_v37 = vld [vmem:[%s4195_s1 + $0x2c0] sm:$0xff] }
  0x5c   :  { %615 = vmatprep.mubr.f32.mxu0 %v46_v54  ;;  %2351 = vmatpush1.bf16.msra.mxu0 %v2670_v49  ;;  %v49_v49 = vld [vmem:[%s4195_s1 + $0x100] sm:$0xff]  ;;  %v110_v54 = vld [vmem:[%s4195_s1 + $0x2e8] sm:$0xff] }
  0x5d   :  { %2352 = vmatprep.subr.bf16.mxu0 %v2508_v0  ;;  %1036 = vmatmul.mubr.f32.gmra.mrb[26].mxu1 %v75_v59  ;;  %v139_v59 = vld [vmem:[%s4195_s1 + $0x3d0] sm:$0xff] }
  0x5e   :  { %2164 = vmatprep.mubr.msk.f32.mxu1 %vm323_vm0, %v80_v60  ;;  %v144_v60 = vld [vmem:[%s4195_s1 + $0x3f8] sm:$0xff] }
  0x5f   :  { %616 = vmatmul.mubr.f32.gmra.mrb[14].mxu0 %v45_v43  ;;  %v109_v43 = vld [vmem:[%s4195_s1 + $0x2e0] sm:$0xff] }
  0x60   :  { %620 = vmatprep.mubr.f32.mxu0 %v50_v58  ;;  %2354 = vmatpush1.bf16.msra.mxu0 %v2687_v55  ;;  %v53_v55 = vld [vmem:[%s4195_s1 + $0x120] sm:$0xff]  ;;  %v114_v58 = vld [vmem:[%s4195_s1 + $0x308] sm:$0xff] }
  0x61   :  { %2355 = vmatprep.subr.bf16.mxu0 %v2508_v0  ;;  %v58_v0 = vld [vmem:[%s4195_s1 + $0x148] sm:$0xff]  ;;  %1041 = vmatmul.mubr.f32.gmra.mrb[28].mxu1 %v79_v63  ;;  %v143_v63 = vld [vmem:[%s4195_s1 + $0x3f0] sm:$0xff] }
  0x62   :  { %2165 = vmatprep.mubr.msk.f32.mxu1 %vm323_vm0, %v84_v1  ;;  %v148_v1 = vld [vmem:[%s4195_s1 + $0x418] sm:$0xff] }
  0x63   :  { %621 = vmatmul.mubr.f32.gmra.mrb[16].mxu0 %v49_v49  ;;  %v113_v49 = vld [vmem:[%s4195_s1 + $0x300] sm:$0xff] }
  0x64   :  { %625 = vmatprep.mubr.f32.mxu0 %v54_v62  ;;  %2357 = vmatpush1.bf16.msra.mxu0 %v2704_v61  ;;  %v57_v61 = vld [vmem:[%s4195_s1 + $0x140] sm:$0xff]  ;;  %v118_v62 = vld [vmem:[%s4195_s1 + $0x328] sm:$0xff] }
  0x65   :  { %1046 = vmatmul.mubr.f32.gmra.mrb[30].mxu1 %v83_v2  ;;  %v147_v2 = vld [vmem:[%s4195_s1 + $0x410] sm:$0xff] }
  0x66   :  { %2166 = vmatprep.mubr.msk.f32.mxu1 %vm323_vm0, %v88_v3  ;;  %v152_v3 = vld [vmem:[%s4195_s1 + $0x438] sm:$0xff] }
  0x67   :  { %626 = vmatmul.mubr.f32.gmra.mrb[18].mxu0 %v53_v55  ;;  %v117_v55 = vld [vmem:[%s4195_s1 + $0x320] sm:$0xff] }
  0x68   :  { %630 = vmatprep.mubr.f32.mxu0 %v58_v0  ;;  %v122_v0 = vld [vmem:[%s4195_s1 + $0x348] sm:$0xff] }
  0x69   :  { %1051 = vmatmul.mubr.f32.gmra.mrb[32].mxu1 %v87_v5  ;;  %v151_v5 = vld [vmem:[%s4195_s1 + $0x430] sm:$0xff] }
  0x6a   :  { %2167 = vmatprep.mubr.msk.f32.mxu1 %vm323_vm0, %v92_v6  ;;  %v156_v6 = vld [vmem:[%s4195_s1 + $0x458] sm:$0xff] }
  0x6b   :  { %631 = vmatmul.mubr.f32.gmra.mrb[20].mxu0 %v57_v61  ;;  %v121_v61 = vld [vmem:[%s4195_s1 + $0x340] sm:$0xff] }
  0x6c   :  { %635 = vmatprep.mubr.f32.mxu0 %v62_v4  ;;  %v126_v4 = vld [vmem:[%s4195_s1 + $0x368] sm:$0xff] }
  0x6d   :  { %1056 = vmatmul.mubr.f32.gmra.mrb[34].mxu1 %v91_v9  ;;  %v155_v9 = vld [vmem:[%s4195_s1 + $0x450] sm:$0xff] }
  0x6e   :  { %2168 = vmatprep.mubr.msk.f32.mxu1 %vm323_vm0, %v96_v10  ;;  %v160_v10 = vld [vmem:[%s4195_s1 + $0x478] sm:$0xff] }
  0x6f   :  { %636 = vmatmul.mubr.f32.gmra.mrb[22].mxu0 %v61_v7  ;;  %v125_v7 = vld [vmem:[%s4195_s1 + $0x360] sm:$0xff] }
  0x70   :  { %640 = vmatprep.mubr.f32.mxu0 %v66_v8  ;;  %v130_v8 = vld [vmem:[%s4195_s1 + $0x388] sm:$0xff] }
  0x71   :  { %1061 = vmatmul.mubr.f32.gmra.mrb[36].mxu1 %v95_v14  ;;  %v159_v14 = vld [vmem:[%s4195_s1 + $0x470] sm:$0xff] }
  0x72   :  { %2169 = vmatprep.mubr.msk.f32.mxu1 %vm323_vm0, %v100_v15  ;;  %v164_v15 = vld [vmem:[%s4195_s1 + $0x498] sm:$0xff] }
  0x73   :  { %641 = vmatmul.mubr.f32.gmra.mrb[24].mxu0 %v65_v11  ;;  %v129_v11 = vld [vmem:[%s4195_s1 + $0x380] sm:$0xff] }
  0x74   :  { %645 = vmatprep.mubr.f32.mxu0 %v70_v13  ;;  %v134_v13 = vld [vmem:[%s4195_s1 + $0x3a8] sm:$0xff] }
  0x75   :  { %1066 = vmatmul.mubr.f32.gmra.mrb[38].mxu1 %v99_v19  ;;  %v163_v19 = vld [vmem:[%s4195_s1 + $0x490] sm:$0xff] }
  0x76   :  { %2170 = vmatprep.mubr.msk.f32.mxu1 %vm323_vm0, %v104_v20  ;;  %v168_v20 = vld [vmem:[%s4195_s1 + $0x4b8] sm:$0xff] }
  0x77   :  { %646 = vmatmul.mubr.f32.gmra.mrb[26].mxu0 %v69_v16  ;;  %v133_v16 = vld [vmem:[%s4195_s1 + $0x3a0] sm:$0xff] }
  0x78   :  { %650 = vmatprep.mubr.f32.mxu0 %v74_v18  ;;  %v138_v18 = vld [vmem:[%s4195_s1 + $0x3c8] sm:$0xff] }
  0x79   :  { %1071 = vmatmul.mubr.f32.gmra.mrb[40].mxu1 %v103_v24  ;;  %v167_v24 = vld [vmem:[%s4195_s1 + $0x4b0] sm:$0xff] }
  0x7a   :  { %2171 = vmatprep.mubr.msk.f32.mxu1 %vm323_vm0, %v108_v25  ;;  %v172_v25 = vld [vmem:[%s4195_s1 + $0x4d8] sm:$0xff] }
  0x7b   :  { %651 = vmatmul.mubr.f32.gmra.mrb[28].mxu0 %v73_v21  ;;  %v137_v21 = vld [vmem:[%s4195_s1 + $0x3c0] sm:$0xff] }
  0x7c   :  { %655 = vmatprep.mubr.f32.mxu0 %v78_v22  ;;  %v142_v22 = vld [vmem:[%s4195_s1 + $0x3e8] sm:$0xff] }
  0x7d   :  { %1076 = vmatmul.mubr.f32.gmra.mrb[42].mxu1 %v107_v28  ;;  %v171_v28 = vld [vmem:[%s4195_s1 + $0x4d0] sm:$0xff] }
  0x7e   :  { %2172 = vmatprep.mubr.msk.f32.mxu1 %vm323_vm0, %v112_v29  ;;  %v176_v29 = vld [vmem:[%s4195_s1 + $0x4f8] sm:$0xff] }
  0x7f   :  { %656 = vmatmul.mubr.f32.gmra.mrb[30].mxu0 %v77_v26  ;;  %v141_v26 = vld [vmem:[%s4195_s1 + $0x3e0] sm:$0xff] }
  0x80   :  { %660 = vmatprep.mubr.f32.mxu0 %v82_v27  ;;  %v146_v27 = vld [vmem:[%s4195_s1 + $0x408] sm:$0xff] }
  0x81   :  { %1081 = vmatmul.mubr.f32.gmra.mrb[44].mxu1 %v111_v33  ;;  %v175_v33 = vld [vmem:[%s4195_s1 + $0x4f0] sm:$0xff] }
  0x82   :  { %2173 = vmatprep.mubr.msk.f32.mxu1 %vm323_vm0, %v116_v34  ;;  %v180_v34 = vld [vmem:[%s4195_s1 + $0x518] sm:$0xff] }
  0x83   :  { %661 = vmatmul.mubr.f32.gmra.mrb[32].mxu0 %v81_v31  ;;  %v145_v31 = vld [vmem:[%s4195_s1 + $0x400] sm:$0xff] }
  0x84   :  { %665 = vmatprep.mubr.f32.mxu0 %v86_v32  ;;  %v150_v32 = vld [vmem:[%s4195_s1 + $0x428] sm:$0xff] }
  0x85   :  { %1086 = vmatmul.mubr.f32.gmra.mrb[46].mxu1 %v115_v38  ;;  %v179_v38 = vld [vmem:[%s4195_s1 + $0x510] sm:$0xff] }
  0x86   :  { %2174 = vmatprep.mubr.msk.f32.mxu1 %vm323_vm0, %v120_v39  ;;  %v184_v39 = vld [vmem:[%s4195_s1 + $0x538] sm:$0xff] }
  0x87   :  { %666 = vmatmul.mubr.f32.gmra.mrb[34].mxu0 %v85_v35  ;;  %v149_v35 = vld [vmem:[%s4195_s1 + $0x420] sm:$0xff] }
  0x88   :  { %670 = vmatprep.mubr.f32.mxu0 %v90_v36  ;;  %v154_v36 = vld [vmem:[%s4195_s1 + $0x448] sm:$0xff] }
  0x89   :  { %1091 = vmatmul.mubr.f32.gmra.mrb[48].mxu1 %v119_v41  ;;  %v183_v41 = vld [vmem:[%s4195_s1 + $0x530] sm:$0xff] }
  0x8a   :  { %2175 = vmatprep.mubr.msk.f32.mxu1 %vm323_vm0, %v124_v42  ;;  %v188_v42 = vld [vmem:[%s4195_s1 + $0x558] sm:$0xff] }
  0x8b   :  { %671 = vmatmul.mubr.f32.gmra.mrb[36].mxu0 %v89_v12  ;;  %v153_v12 = vld [vmem:[%s4195_s1 + $0x440] sm:$0xff] }
  0x8c   :  { %675 = vmatprep.mubr.f32.mxu0 %v94_v40  ;;  %v158_v40 = vld [vmem:[%s4195_s1 + $0x468] sm:$0xff] }
  0x8d   :  { %1096 = vmatmul.mubr.f32.gmra.mrb[50].mxu1 %v123_v45  ;;  %v187_v45 = vld [vmem:[%s4195_s1 + $0x550] sm:$0xff] }
  0x8e   :  { %2176 = vmatprep.mubr.msk.f32.mxu1 %vm323_vm0, %v128_v46  ;;  %v192_v46 = vld [vmem:[%s4195_s1 + $0x578] sm:$0xff] }
  0x8f   :  { %676 = vmatmul.mubr.f32.gmra.mrb[38].mxu0 %v93_v17  ;;  %v157_v17 = vld [vmem:[%s4195_s1 + $0x460] sm:$0xff] }
  0x90   :  { %680 = vmatprep.mubr.f32.mxu0 %v98_v44  ;;  %v162_v44 = vld [vmem:[%s4195_s1 + $0x488] sm:$0xff] }
  0x91   :  { %1101 = vmatmul.mubr.f32.gmra.mrb[52].mxu1 %v127_v48  ;;  %v191_v48 = vld [vmem:[%s4195_s1 + $0x570] sm:$0xff] }
  0x92   :  { %2177 = vmatprep.mubr.msk.f32.mxu1 %vm323_vm0, %v132_v50  ;;  %v196_v50 = vld [vmem:[%s4195_s1 + $0x598] sm:$0xff] }
  0x93   :  { %681 = vmatmul.mubr.f32.gmra.mrb[40].mxu0 %v97_v23  ;;  %v161_v23 = vld [vmem:[%s4195_s1 + $0x480] sm:$0xff] }
  0x94   :  { %685 = vmatprep.mubr.f32.mxu0 %v102_v47  ;;  %v166_v47 = vld [vmem:[%s4195_s1 + $0x4a8] sm:$0xff] }
  0x95   :  { %1106 = vmatmul.mubr.f32.gmra.mrb[54].mxu1 %v131_v52  ;;  %v195_v52 = vld [vmem:[%s4195_s1 + $0x590] sm:$0xff] }
  0x96   :  { %2178 = vmatprep.mubr.msk.f32.mxu1 %vm323_vm0, %v136_v53  ;;  %v200_v53 = vld [vmem:[%s4195_s1 + $0x5b8] sm:$0xff] }
  0x97   :  { %686 = vmatmul.mubr.f32.gmra.mrb[42].mxu0 %v101_v30  ;;  %v165_v30 = vld [vmem:[%s4195_s1 + $0x4a0] sm:$0xff] }
  0x98   :  { %690 = vmatprep.mubr.f32.mxu0 %v106_v51  ;;  %v170_v51 = vld [vmem:[%s4195_s1 + $0x4c8] sm:$0xff] }
  0x99   :  { %1111 = vmatmul.mubr.f32.gmra.mrb[56].mxu1 %v135_v56  ;;  %v199_v56 = vld [vmem:[%s4195_s1 + $0x5b0] sm:$0xff] }
  0x9a   :  { %2179 = vmatprep.mubr.msk.f32.mxu1 %vm323_vm0, %v140_v57  ;;  %v204_v57 = vld [vmem:[%s4195_s1 + $0x5d8] sm:$0xff] }
  0x9b   :  { %691 = vmatmul.mubr.f32.gmra.mrb[44].mxu0 %v105_v37  ;;  %v169_v37 = vld [vmem:[%s4195_s1 + $0x4c0] sm:$0xff] }
  0x9c   :  { %695 = vmatprep.mubr.f32.mxu0 %v110_v54  ;;  %v174_v54 = vld [vmem:[%s4195_s1 + $0x4e8] sm:$0xff] }
  0x9d   :  { %1116 = vmatmul.mubr.f32.gmra.mrb[58].mxu1 %v139_v59  ;;  %v203_v59 = vld [vmem:[%s4195_s1 + $0x5d0] sm:$0xff] }
  0x9e   :  { %2180 = vmatprep.mubr.msk.f32.mxu1 %vm323_vm0, %v144_v60  ;;  %v208_v60 = vld [vmem:[%s4195_s1 + $0x5f8] sm:$0xff] }
  0x9f   :  { %696 = vmatmul.mubr.f32.gmra.mrb[46].mxu0 %v109_v43  ;;  %v173_v43 = vld [vmem:[%s4195_s1 + $0x4e0] sm:$0xff] }
  0xa0   :  { %700 = vmatprep.mubr.f32.mxu0 %v114_v58  ;;  %v178_v58 = vld [vmem:[%s4195_s1 + $0x508] sm:$0xff] }
  0xa1   :  { %1121 = vmatmul.mubr.f32.gmra.mrb[60].mxu1 %v143_v63  ;;  %v207_v63 = vld [vmem:[%s4195_s1 + $0x5f0] sm:$0xff] }
  0xa2   :  { %2181 = vmatprep.mubr.msk.f32.mxu1 %vm323_vm0, %v148_v1  ;;  %v212_v1 = vld [vmem:[%s4195_s1 + $0x618] sm:$0xff] }
  0xa3   :  { %701 = vmatmul.mubr.f32.gmra.mrb[48].mxu0 %v113_v49  ;;  %v177_v49 = vld [vmem:[%s4195_s1 + $0x500] sm:$0xff] }
  0xa4   :  { %705 = vmatprep.mubr.f32.mxu0 %v118_v62  ;;  %v182_v62 = vld [vmem:[%s4195_s1 + $0x528] sm:$0xff] }
  0xa5   :  { %1126 = vmatmul.mubr.f32.gmra.mrb[62].mxu1 %v147_v2  ;;  %v211_v2 = vld [vmem:[%s4195_s1 + $0x610] sm:$0xff] }
  0xa6   :  { %2182 = vmatprep.mubr.msk.f32.mxu1 %vm323_vm0, %v152_v3  ;;  %v216_v3 = vld [vmem:[%s4195_s1 + $0x638] sm:$0xff] }
  0xa7   :  { %706 = vmatmul.mubr.f32.gmra.mrb[50].mxu0 %v117_v55  ;;  %v181_v55 = vld [vmem:[%s4195_s1 + $0x520] sm:$0xff] }
  0xa8   :  { %710 = vmatprep.mubr.f32.mxu0 %v122_v0  ;;  %v186_v0 = vld [vmem:[%s4195_s1 + $0x548] sm:$0xff] }
  0xa9   :  { %1131 = vmatmul.mubr.f32.gmra.mrb[64].mxu1 %v151_v5  ;;  %v215_v5 = vld [vmem:[%s4195_s1 + $0x630] sm:$0xff] }
  0xaa   :  { %2183 = vmatprep.mubr.msk.f32.mxu1 %vm323_vm0, %v156_v6  ;;  %v220_v6 = vld [vmem:[%s4195_s1 + $0x658] sm:$0xff] }
  0xab   :  { %711 = vmatmul.mubr.f32.gmra.mrb[52].mxu0 %v121_v61  ;;  %v185_v61 = vld [vmem:[%s4195_s1 + $0x540] sm:$0xff] }
  0xac   :  { %715 = vmatprep.mubr.f32.mxu0 %v126_v4  ;;  %v190_v4 = vld [vmem:[%s4195_s1 + $0x568] sm:$0xff] }
  0xad   :  { %1136 = vmatmul.mubr.f32.gmra.mrb[66].mxu1 %v155_v9  ;;  %v219_v9 = vld [vmem:[%s4195_s1 + $0x650] sm:$0xff] }
  0xae   :  { %2184 = vmatprep.mubr.msk.f32.mxu1 %vm323_vm0, %v160_v10  ;;  %v224_v10 = vld [vmem:[%s4195_s1 + $0x678] sm:$0xff] }
  0xaf   :  { %716 = vmatmul.mubr.f32.gmra.mrb[54].mxu0 %v125_v7  ;;  %v189_v7 = vld [vmem:[%s4195_s1 + $0x560] sm:$0xff] }
  0xb0   :  { %720 = vmatprep.mubr.f32.mxu0 %v130_v8  ;;  %v194_v8 = vld [vmem:[%s4195_s1 + $0x588] sm:$0xff] }
  0xb1   :  { %1141 = vmatmul.mubr.f32.gmra.mrb[68].mxu1 %v159_v14  ;;  %v223_v14 = vld [vmem:[%s4195_s1 + $0x670] sm:$0xff] }
  0xb2   :  { %2185 = vmatprep.mubr.msk.f32.mxu1 %vm323_vm0, %v164_v15  ;;  %v228_v15 = vld [vmem:[%s4195_s1 + $0x698] sm:$0xff] }
  0xb3   :  { %721 = vmatmul.mubr.f32.gmra.mrb[56].mxu0 %v129_v11  ;;  %v193_v11 = vld [vmem:[%s4195_s1 + $0x580] sm:$0xff] }
  0xb4   :  { %725 = vmatprep.mubr.f32.mxu0 %v134_v13  ;;  %v198_v13 = vld [vmem:[%s4195_s1 + $0x5a8] sm:$0xff] }
  0xb5   :  { %1146 = vmatmul.mubr.f32.gmra.mrb[70].mxu1 %v163_v19  ;;  %v227_v19 = vld [vmem:[%s4195_s1 + $0x690] sm:$0xff] }
  0xb6   :  { %2186 = vmatprep.mubr.msk.f32.mxu1 %vm323_vm0, %v168_v20  ;;  %v232_v20 = vld [vmem:[%s4195_s1 + $0x6b8] sm:$0xff] }
  0xb7   :  { %726 = vmatmul.mubr.f32.gmra.mrb[58].mxu0 %v133_v16  ;;  %v197_v16 = vld [vmem:[%s4195_s1 + $0x5a0] sm:$0xff] }
  0xb8   :  { %730 = vmatprep.mubr.f32.mxu0 %v138_v18  ;;  %v202_v18 = vld [vmem:[%s4195_s1 + $0x5c8] sm:$0xff] }
  0xb9   :  { %1151 = vmatmul.mubr.f32.gmra.mrb[72].mxu1 %v167_v24  ;;  %v231_v24 = vld [vmem:[%s4195_s1 + $0x6b0] sm:$0xff] }
  0xba   :  { %2187 = vmatprep.mubr.msk.f32.mxu1 %vm323_vm0, %v172_v25  ;;  %v236_v25 = vld [vmem:[%s4195_s1 + $0x6d8] sm:$0xff] }
  0xbb   :  { %731 = vmatmul.mubr.f32.gmra.mrb[60].mxu0 %v137_v21  ;;  %v201_v21 = vld [vmem:[%s4195_s1 + $0x5c0] sm:$0xff] }
  0xbc   :  { %735 = vmatprep.mubr.f32.mxu0 %v142_v22  ;;  %v206_v22 = vld [vmem:[%s4195_s1 + $0x5e8] sm:$0xff] }
  0xbd   :  { %1156 = vmatmul.mubr.f32.gmra.mrb[74].mxu1 %v171_v28  ;;  %v235_v28 = vld [vmem:[%s4195_s1 + $0x6d0] sm:$0xff] }
  0xbe   :  { %2188 = vmatprep.mubr.msk.f32.mxu1 %vm323_vm0, %v176_v29  ;;  %v240_v29 = vld [vmem:[%s4195_s1 + $0x6f8] sm:$0xff] }
  0xbf   :  { %736 = vmatmul.mubr.f32.gmra.mrb[62].mxu0 %v141_v26  ;;  %v205_v26 = vld [vmem:[%s4195_s1 + $0x5e0] sm:$0xff] }
  0xc0   :  { %740 = vmatprep.mubr.f32.mxu0 %v146_v27  ;;  %v210_v27 = vld [vmem:[%s4195_s1 + $0x608] sm:$0xff] }
  0xc1   :  { %1161 = vmatmul.mubr.f32.gmra.mrb[76].mxu1 %v175_v33  ;;  %v214_v33 = vld [vmem:[%s4195_s1 + $0x628] sm:$0xff] }
  0xc2   :  { %2189 = vmatprep.mubr.msk.f32.mxu1 %vm323_vm0, %v180_v34 }
  0xc3   :  { %741 = vmatmul.mubr.f32.gmra.mrb[64].mxu0 %v145_v31  ;;  %v209_v31 = vld [vmem:[%s4195_s1 + $0x600] sm:$0xff] }
  0xc4   :  { %745 = vmatprep.mubr.f32.mxu0 %v150_v32 }
  0xc5   :  { %1166 = vmatmul.mubr.f32.gmra.mrb[78].mxu1 %v179_v38  ;;  %v213_v38 = vld [vmem:[%s4195_s1 + $0x620] sm:$0xff] }
  0xc6   :  { %2190 = vmatprep.mubr.msk.f32.mxu1 %vm323_vm0, %v184_v39 }
  0xc7   :  { %746 = vmatmul.mubr.f32.gmra.mrb[66].mxu0 %v149_v35  ;;  %v239_v35 = vld [vmem:[%s4195_s1 + $0x6f0] sm:$0xff] }
  0xc8   :  { %750 = vmatprep.mubr.f32.mxu0 %v154_v36  ;;  %v244_v36 = vld [vmem:[%s4195_s1 + $0x718] sm:$0xff] }
  0xc9   :  { %1171 = vmatmul.mubr.f32.gmra.mrb[80].mxu1 %v183_v41  ;;  %v243_v41 = vld [vmem:[%s4195_s1 + $0x710] sm:$0xff] }
  0xca   :  { %2191 = vmatprep.mubr.msk.f32.mxu1 %vm323_vm0, %v188_v42  ;;  %v248_v42 = vld [vmem:[%s4195_s1 + $0x738] sm:$0xff] }
  0xcb   :  { %751 = vmatmul.mubr.f32.gmra.mrb[68].mxu0 %v153_v12  ;;  %v218_v12 = vld [vmem:[%s4195_s1 + $0x648] sm:$0xff] }
  0xcc   :  { %755 = vmatprep.mubr.f32.mxu0 %v158_v40 }
  0xcd   :  { %1176 = vmatmul.mubr.f32.gmra.mrb[82].mxu1 %v187_v45  ;;  %v222_v45 = vld [vmem:[%s4195_s1 + $0x668] sm:$0xff] }
  0xce   :  { %2192 = vmatprep.mubr.msk.f32.mxu1 %vm323_vm0, %v192_v46 }
  0xcf   :  { %756 = vmatmul.mubr.f32.gmra.mrb[70].mxu0 %v157_v17  ;;  %v217_v17 = vld [vmem:[%s4195_s1 + $0x640] sm:$0xff] }
  0xd0   :  { %760 = vmatprep.mubr.f32.mxu0 %v162_v44 }
  0xd1   :  { %1181 = vmatmul.mubr.f32.gmra.mrb[84].mxu1 %v191_v48  ;;  %v221_v48 = vld [vmem:[%s4195_s1 + $0x660] sm:$0xff] }
  0xd2   :  { %2193 = vmatprep.mubr.msk.f32.mxu1 %vm323_vm0, %v196_v50 }
  0xd3   :  { %761 = vmatmul.mubr.f32.gmra.mrb[72].mxu0 %v161_v23  ;;  %v247_v23 = vld [vmem:[%s4195_s1 + $0x730] sm:$0xff] }
  0xd4   :  { %765 = vmatprep.mubr.f32.mxu0 %v166_v47  ;;  %v252_v47 = vld [vmem:[%s4195_s1 + $0x758] sm:$0xff] }
  0xd5   :  { %1186 = vmatmul.mubr.f32.gmra.mrb[86].mxu1 %v195_v52  ;;  %v251_v52 = vld [vmem:[%s4195_s1 + $0x750] sm:$0xff] }
  0xd6   :  { %2194 = vmatprep.mubr.msk.f32.mxu1 %vm323_vm0, %v200_v53  ;;  %v256_v53 = vld [vmem:[%s4195_s1 + $0x778] sm:$0xff] }
  0xd7   :  { %766 = vmatmul.mubr.f32.gmra.mrb[74].mxu0 %v165_v30  ;;  %v226_v30 = vld [vmem:[%s4195_s1 + $0x688] sm:$0xff] }
  0xd8   :  { %770 = vmatprep.mubr.f32.mxu0 %v170_v51 }
  0xd9   :  { %1191 = vmatmul.mubr.f32.gmra.mrb[88].mxu1 %v199_v56  ;;  %v230_v56 = vld [vmem:[%s4195_s1 + $0x6a8] sm:$0xff] }
  0xda   :  { %2195 = vmatprep.mubr.msk.f32.mxu1 %vm323_vm0, %v204_v57 }
  0xdb   :  { %771 = vmatmul.mubr.f32.gmra.mrb[76].mxu0 %v169_v37  ;;  %v225_v37 = vld [vmem:[%s4195_s1 + $0x680] sm:$0xff] }
  0xdc   :  { %775 = vmatprep.mubr.f32.mxu0 %v174_v54 }
  0xdd   :  { %1196 = vmatmul.mubr.f32.gmra.mrb[90].mxu1 %v203_v59  ;;  %v229_v59 = vld [vmem:[%s4195_s1 + $0x6a0] sm:$0xff] }
  0xde   :  { %2196 = vmatprep.mubr.msk.f32.mxu1 %vm323_vm0, %v208_v60 }
  0xdf   :  { %776 = vmatmul.mubr.f32.gmra.mrb[78].mxu0 %v173_v43  ;;  %v255_v43 = vld [vmem:[%s4195_s1 + $0x770] sm:$0xff] }
  0xe0   :  { %780 = vmatprep.mubr.f32.mxu0 %v178_v58  ;;  %v260_v58 = vld [vmem:[%s4195_s1 + $0x798] sm:$0xff] }
  0xe1   :  { %1201 = vmatmul.mubr.f32.gmra.mrb[92].mxu1 %v207_v63  ;;  %v259_v63 = vld [vmem:[%s4195_s1 + $0x790] sm:$0xff] }
  0xe2   :  { %2197 = vmatprep.mubr.msk.f32.mxu1 %vm323_vm0, %v212_v1  ;;  %v264_v1 = vld [vmem:[%s4195_s1 + $0x7b8] sm:$0xff] }
  0xe3   :  { %781 = vmatmul.mubr.f32.gmra.mrb[80].mxu0 %v177_v49  ;;  %v234_v49 = vld [vmem:[%s4195_s1 + $0x6c8] sm:$0xff] }
  0xe4   :  { %785 = vmatprep.mubr.f32.mxu0 %v182_v62 }
  0xe5   :  { %1206 = vmatmul.mubr.f32.gmra.mrb[94].mxu1 %v211_v2  ;;  %v238_v2 = vld [vmem:[%s4195_s1 + $0x6e8] sm:$0xff] }
  0xe6   :  { %2198 = vmatprep.mubr.msk.f32.mxu1 %vm323_vm0, %v216_v3 }
  0xe7   :  { %786 = vmatmul.mubr.f32.gmra.mrb[82].mxu0 %v181_v55  ;;  %v233_v55 = vld [vmem:[%s4195_s1 + $0x6c0] sm:$0xff] }
  0xe8   :  { %790 = vmatprep.mubr.f32.mxu0 %v186_v0 }
  0xe9   :  { %1211 = vmatmul.mubr.f32.gmra.mrb[96].mxu1 %v215_v5 }
  0xea   :  { %2199 = vmatprep.mubr.msk.f32.mxu1 %vm323_vm0, %v220_v6 }
  0xeb   :  { %791 = vmatmul.mubr.f32.gmra.mrb[84].mxu0 %v185_v61 }
  0xec   :  { %795 = vmatprep.mubr.f32.mxu0 %v190_v4  ;;  %v263_v4 = vld [vmem:[%s4195_s1 + $0x7b0] sm:$0xff] }
  0xed   :  { %1216 = vmatmul.mubr.f32.gmra.mrb[98].mxu1 %v219_v9 }
  0xee   :  { %2200 = vmatprep.mubr.msk.f32.mxu1 %vm323_vm0, %v224_v10  ;;  %v242_v10 = vld [vmem:[%s4195_s1 + $0x708] sm:$0xff] }
  0xef   :  { %796 = vmatmul.mubr.f32.gmra.mrb[86].mxu0 %v189_v7  ;;  %v268_v7 = vld [vmem:[%s4195_s1 + $0x7d8] sm:$0xff] }
  0xf0   :  { %800 = vmatprep.mubr.f32.mxu0 %v194_v8  ;;  %v237_v8 = vld [vmem:[%s4195_s1 + $0x6e0] sm:$0xff] }
  0xf1   :  { %1221 = vmatmul.mubr.f32.gmra.mrb[100].mxu1 %v223_v14  ;;  %v267_v14 = vld [vmem:[%s4195_s1 + $0x7d0] sm:$0xff] }
  0xf2   :  { %2201 = vmatprep.mubr.msk.f32.mxu1 %vm323_vm0, %v228_v15 }
  0xf3   :  { %801 = vmatmul.mubr.f32.gmra.mrb[88].mxu0 %v193_v11 }
  0xf4   :  { %805 = vmatprep.mubr.f32.mxu0 %v198_v13 }
  0xf5   :  { %1226 = vmatmul.mubr.f32.gmra.mrb[102].mxu1 %v227_v19  ;;  %v241_v19 = vld [vmem:[%s4195_s1 + $0x700] sm:$0xff] }
  0xf6   :  { %2202 = vmatprep.mubr.msk.f32.mxu1 %vm323_vm0, %v232_v20 }
  0xf7   :  { %806 = vmatmul.mubr.f32.gmra.mrb[90].mxu0 %v197_v16 }
  0xf8   :  { %810 = vmatprep.mubr.f32.mxu0 %v202_v18  ;;  %v272_v18 = vld [vmem:[%s4195_s1 + $0x7f8] sm:$0xff] }
  0xf9   :  { %1231 = vmatmul.mubr.f32.gmra.mrb[104].mxu1 %v231_v24 }
  0xfa   :  { %2203 = vmatprep.mubr.msk.f32.mxu1 %vm323_vm0, %v236_v25 }
  0xfb   :  { %811 = vmatmul.mubr.f32.gmra.mrb[92].mxu0 %v201_v21 }
  0xfc   :  { %815 = vmatprep.mubr.f32.mxu0 %v206_v22  ;;  %v3430_v32 = vpop.f32.mrb[0].mxu1 }
  0xfd   :  { %1236 = vmatmul.mubr.f32.gmra.mrb[106].mxu1 %v235_v28  ;;  %v974_v34 = vpop.f32.mrb[1].mxu1 }
  0xfe   :  { %2204 = vmatprep.mubr.msk.f32.mxu1 %vm323_vm0, %v240_v29  ;;  %v271_v29 = vld [vmem:[%s4195_s1 + $0x7f0] sm:$0xff] }
  0xff   :  { %816 = vmatmul.mubr.f32.gmra.mrb[94].mxu0 %v205_v26  ;;  %v246_v26 = vld [vmem:[%s4195_s1 + $0x728] sm:$0xff] }
 0x100   :  { %820 = vmatprep.mubr.f32.mxu0 %v210_v27  ;;  %v3445_v39 = vpop.f32.mrb[2].mxu1 }
 0x101   :  { %1241 = vmatmul.mubr.f32.gmra.mrb[108].mxu1 %v239_v35  ;;  %v979_v40 = vpop.f32.mrb[3].mxu1 }
 0x102   :  { %2205 = vmatprep.mubr.msk.f32.mxu1 %vm323_vm0, %v244_v36  ;;  %v245_v36 = vld [vmem:[%s4195_s1 + $0x720] sm:$0xff]  ;;  %v250_v40 = vld [vmem:[%s4195_s1 + $0x748] sm:$0xff] }
 0x103   :  { %821 = vmatmul.mubr.f32.gmra.mrb[96].mxu0 %v209_v31 }
 0x104   :  { %825 = vmatprep.mubr.f32.mxu0 %v214_v33  ;;  %v3460_v44 = vpop.f32.mrb[4].mxu1 }
 0x105   :  { %1246 = vmatmul.mubr.f32.gmra.mrb[110].mxu1 %v243_v41  ;;  %v984_v46 = vpop.f32.mrb[5].mxu1 }
 0x106   :  { %2206 = vmatprep.mubr.msk.f32.mxu1 %vm323_vm0, %v248_v42 }
 0x107   :  { %826 = vmatmul.mubr.f32.gmra.mrb[98].mxu0 %v213_v38 }
 0x108   :  { %830 = vmatprep.mubr.f32.mxu0 %v218_v12  ;;  %v3475_v50 = vpop.f32.mrb[6].mxu1 }
 0x109   :  { %1251 = vmatmul.mubr.f32.gmra.mrb[112].mxu1 %v247_v23  ;;  %v989_v51 = vpop.f32.mrb[7].mxu1 }
 0x10a   :  { %2207 = vmatprep.mubr.msk.f32.mxu1 %vm323_vm0, %v252_v47 }
 0x10b   :  { %831 = vmatmul.mubr.f32.gmra.mrb[100].mxu0 %v217_v17 }
 0x10c   :  { %835 = vmatprep.mubr.f32.mxu0 %v222_v45  ;;  %v3490_v54 = vpop.f32.mrb[8].mxu1 }
 0x10d   :  { %1256 = vmatmul.mubr.f32.gmra.mrb[114].mxu1 %v251_v52  ;;  %v994_v57 = vpop.f32.mrb[9].mxu1 }
 0x10e   :  { %2208 = vmatprep.mubr.msk.f32.mxu1 %vm323_vm0, %v256_v53  ;;  %v254_v53 = vld [vmem:[%s4195_s1 + $0x768] sm:$0xff] }
 0x10f   :  { %836 = vmatmul.mubr.f32.gmra.mrb[102].mxu0 %v221_v48  ;;  %v249_v48 = vld [vmem:[%s4195_s1 + $0x740] sm:$0xff] }
 0x110   :  { %840 = vmatprep.mubr.f32.mxu0 %v226_v30  ;;  %v3505_v60 = vpop.f32.mrb[10].mxu1 }
 0x111   :  { %1261 = vmatmul.mubr.f32.gmra.mrb[116].mxu1 %v255_v43  ;;  %v999_v62 = vpop.f32.mrb[11].mxu1 }
 0x112   :  { %2209 = vmatprep.mubr.msk.f32.mxu1 %vm323_vm0, %v260_v58  ;;  %v253_v62 = vld [vmem:[%s4195_s1 + $0x760] sm:$0xff] }
 0x113   :  { %841 = vmatmul.mubr.f32.gmra.mrb[104].mxu0 %v225_v37 }
 0x114   :  { %845 = vmatprep.mubr.f32.mxu0 %v230_v56  ;;  %v3520_v0 = vpop.f32.mrb[12].mxu1 }
 0x115   :  { %1266 = vmatmul.mubr.f32.gmra.mrb[118].mxu1 %v259_v63  ;;  %v1004_v3 = vpop.f32.mrb[13].mxu1 }
 0x116   :  { %2210 = vmatprep.mubr.msk.f32.mxu1 %vm323_vm0, %v264_v1  ;;  %v258_v3 = vld [vmem:[%s4195_s1 + $0x788] sm:$0xff] }
 0x117   :  { %846 = vmatmul.mubr.f32.gmra.mrb[106].mxu0 %v229_v59 }
 0x118   :  { %850 = vmatprep.mubr.f32.mxu0 %v234_v49  ;;  %v3538_v9 = vpop.f32.mrb[14].mxu1 }
 0x119   :  { %1271 = vmatmul.mubr.f32.gmra.mrb[120].mxu1 %v263_v4  ;;  %v1009_v11 = vpop.f32.mrb[15].mxu1 }
 0x11a   :  { %v587_v61 = vpop.f32.mrb[2].mxu0  ;;  %2211 = vmatprep.mubr.msk.f32.mxu1 %vm323_vm0, %v268_v7 }
 0x11b   :  { %v3530_v5 = vadd.f32 %v3430_v32, %v587_v61  ;;  %v589_v6 = vpop.f32.mrb[3].mxu0  ;;  %851 = vmatmul.mubr.f32.gmra.mrb[108].mxu0 %v233_v55 }
 0x11c   :  { %855 = vmatprep.mubr.f32.mxu0 %v238_v2  ;;  %v3554_v20 = vpop.f32.mrb[16].mxu1 }
 0x11d   :  { %v4200_v21 = vrot.slane %v3530_v5, 1  ;;  %v4199_v22 = vrot.slane %v3530_v5, 2  ;;  %1276 = vmatmul.mubr.f32.gmra.mrb[122].mxu1 %v267_v14  ;;  %v1014_v27 = vpop.f32.mrb[17].mxu1 }
 0x11e   :  { %v592_v13 = vpop.f32.mrb[4].mxu0  ;;  %2212 = vmatprep.mubr.msk.f32.mxu1 %vm323_vm0, %v272_v18 }
 0x11f   :  { %v978_v15 = vadd.f32 %v3445_v39, %v592_v13  ;;  %v594_v16 = vpop.f32.mrb[5].mxu0  ;;  %856 = vmatmul.mubr.f32.gmra.mrb[110].mxu0 %v237_v8  ;;  %v257_v13 = vld [vmem:[%s4195_s1 + $0x780] sm:$0xff] }
 0x120   :  { %860 = vmatprep.mubr.f32.mxu0 %v242_v10  ;;  %v3575_v38 = vpop.f32.mrb[18].mxu1 }
 0x121   :  { %v1354_v24 = vrot.slane %v978_v15, 1  ;;  %v1548_v25 = vrot.slane %v978_v15, 2  ;;  %1281 = vmatmul.mubr.f32.gmra.mrb[124].mxu1 %v271_v29  ;;  %v1019_v41 = vpop.f32.mrb[19].mxu1 }
 0x122   :  { %v597_v28 = vpop.f32.mrb[6].mxu0 }
 0x123   :  { %v1355_v31 = vsel %vm1350_vm1, %v4200_v21, %v1354_v24  ;;  %v1549_v32 = vsel %vm1544_vm2, %v4199_v22, %v1548_v25  ;;  %v983_v33 = vadd.f32 %v3460_v44, %v597_v28  ;;  %v599_v34 = vpop.f32.mrb[7].mxu0  ;;  %861 = vmatmul.mubr.f32.gmra.mrb[112].mxu0 %v241_v19  ;;  %v262_v19 = vld [vmem:[%s4195_s1 + $0x7a8] sm:$0xff] }
 0x124   :  { %v1739_v35 = vmax.f32 %v1355_v31, %v1549_v32  ;;  %865 = vmatprep.mubr.f32.mxu0 %v246_v26  ;;  %v3589_v30 = vpop.f32.mrb[20].mxu1 }
 0x125   :  { %v1356_v39 = vrot.slane %v983_v33, 1  ;;  %v1550_v12 = vrot.slane %v983_v33, 2  ;;  %v1024_v37 = vpop.f32.mrb[21].mxu1 }
 0x126   :  { %v3581_v42 = vmax.f32 %v3530_v5, %v1739_v35  ;;  %v602_v17 = vpop.f32.mrb[8].mxu0 }
 0x127   :  { %v1357_v44 = vsel %vm1350_vm1, %v1354_v24, %v1356_v39  ;;  %v1551_v45 = vsel %vm1544_vm2, %v1548_v25, %v1550_v12  ;;  %v988_v46 = vadd.f32 %v3475_v50, %v602_v17  ;;  %v604_v23 = vpop.f32.mrb[9].mxu0  ;;  %866 = vmatmul.mubr.f32.gmra.mrb[114].mxu0 %v245_v36 }
 0x128   :  { %v1740_v47 = vmax.f32 %v1357_v44, %v1551_v45  ;;  %870 = vmatprep.mubr.f32.mxu0 %v250_v40  ;;  %v3602_v63 = vpop.f32.mrb[22].mxu1 }
 0x129   :  { %v1358_v51 = vrot.slane %v988_v46, 1  ;;  %v1552_v52 = vrot.slane %v988_v46, 2 }
 0x12a   :  { %v3594_v56 = vmax.f32 %v978_v15, %v1740_v47  ;;  %v607_v50 = vpop.f32.mrb[10].mxu0 }
 0x12b   :  { %v1359_v57 = vsel %vm1350_vm1, %v1356_v39, %v1358_v51  ;;  %v1553_v43 = vsel %vm1544_vm2, %v1550_v12, %v1552_v52  ;;  %v993_v58 = vadd.f32 %v3490_v54, %v607_v50  ;;  %v609_v59 = vpop.f32.mrb[11].mxu0  ;;  %871 = vmatmul.mubr.f32.gmra.mrb[116].mxu0 %v249_v48  ;;  %v1029_v54 = vpop.f32.mrb[23].mxu1  ;;  %v266_v12 = vld [vmem:[%s4195_s1 + $0x7c8] sm:$0xff]  ;;  %v265_v48 = vld [vmem:[%s4195_s1 + $0x7c0] sm:$0xff] }
 0x12c   :  { %v1741_v49 = vmax.f32 %v1359_v57, %v1553_v43  ;;  %875 = vmatprep.mubr.f32.mxu0 %v254_v53  ;;  %v3615_v14 = vpop.f32.mrb[24].mxu1  ;;  %v270_v50 = vld [vmem:[%s4195_s1 + $0x7e8] sm:$0xff] }
 0x12d   :  { %v1360_v55 = vrot.slane %v993_v58, 1  ;;  %v1554_v2 = vrot.slane %v993_v58, 2  ;;  %v1034_v24 = vpop.f32.mrb[25].mxu1 }
 0x12e   :  { %v1805_v61 = vmax.f32 %v983_v33, %v1741_v49  ;;  %v612_v4 = vpop.f32.mrb[12].mxu0  ;;  %v261_v33 = vld [vmem:[%s4195_s1 + $0x7a0] sm:$0xff] }
 0x12f   :  { %v1361_v6 = vsel %vm1350_vm1, %v1358_v51, %v1360_v55  ;;  %v1555_v7 = vsel %vm1544_vm2, %v1552_v52, %v1554_v2  ;;  %v998_v8 = vadd.f32 %v3505_v60, %v612_v4  ;;  %v614_v10 = vpop.f32.mrb[13].mxu0  ;;  %876 = vmatmul.mubr.f32.gmra.mrb[118].mxu0 %v253_v62 }
 0x130   :  { %v1742_v11 = vmax.f32 %v1361_v6, %v1555_v7  ;;  %880 = vmatprep.mubr.f32.mxu0 %v258_v3  ;;  %v1867_v15 = vmax.f32 %v3594_v56, %v1805_v61  ;;  %v3630_v34 = vpop.f32.mrb[26].mxu1  ;;  %v269_v3 = vld [vmem:[%s4195_s1 + $0x7e0] sm:$0xff] }
 0x131   :  { %v1362_v16 = vrot.slane %v998_v8, 1  ;;  %v1556_v18 = vrot.slane %v998_v8, 2  ;;  %v1039_v40 = vpop.f32.mrb[27].mxu1 }
 0x132   :  { %v1806_v60 = vmax.f32 %v988_v46, %v1742_v11  ;;  %v617_v25 = vpop.f32.mrb[14].mxu0  ;;  %v3622_v26 = vmax.f32 %v3581_v42, %v1867_v15 }
 0x133   :  { %v1363_v27 = vsel %vm1350_vm1, %v1360_v55, %v1362_v16  ;;  %v1557_v28 = vsel %vm1544_vm2, %v1554_v2, %v1556_v18  ;;  %v1003_v29 = vadd.f32 %v3520_v0, %v617_v25  ;;  %v619_v31 = vpop.f32.mrb[15].mxu0  ;;  %881 = vmatmul.mubr.f32.gmra.mrb[120].mxu0 %v257_v13  ;;  %v19_v25 = vld [vmem:[%s4195_s1 + $0x10] sm:$0xff] }
 0x134   :  { %v1743_v32 = vmax.f32 %v1363_v27, %v1557_v28  ;;  %885 = vmatprep.mubr.f32.mxu0 %v262_v19  ;;  %v1868_v35 = vmax.f32 %v1805_v61, %v1806_v60  ;;  %v3644_v51 = vpop.f32.mrb[28].mxu1 }
 0x135   :  { %v1364_v36 = vrot.slane %v1003_v29, 1  ;;  %v1558_v39 = vrot.slane %v1003_v29, 2  ;;  %v1044_v57 = vpop.f32.mrb[29].mxu1 }
 0x136   :  { %v1807_v41 = vmax.f32 %v993_v58, %v1743_v32  ;;  %v622_v0 = vpop.f32.mrb[16].mxu0  ;;  %v3636_v17 = vmax.f32 %v3594_v56, %v1868_v35 }
 0x137   :  { %v1365_v44 = vsel %vm1350_vm1, %v1362_v16, %v1364_v36  ;;  %v1559_v45 = vsel %vm1544_vm2, %v1556_v18, %v1558_v39  ;;  %v1008_v46 = vadd.f32 %v3538_v9, %v622_v0  ;;  %v624_v23 = vpop.f32.mrb[17].mxu0  ;;  %886 = vmatmul.mubr.f32.gmra.mrb[122].mxu0 %v261_v33 }
 0x138   :  { %v1744_v47 = vmax.f32 %v1365_v44, %v1559_v45  ;;  %890 = vmatprep.mubr.f32.mxu0 %v266_v12  ;;  %v1869_v52 = vmax.f32 %v1806_v60, %v1807_v41  ;;  %v3657_v54 = vpop.f32.mrb[30].mxu1 }
 0x139   :  { %v1366_v53 = vrot.slane %v1008_v46, 1  ;;  %v1560_v37 = vrot.slane %v1008_v46, 2 }
 0x13a   :  { %v1808_v43 = vmax.f32 %v998_v8, %v1744_v47  ;;  %v627_v9 = vpop.f32.mrb[18].mxu0  ;;  %v3649_v58 = vmax.f32 %v1805_v61, %v1869_v52  ;;  %v1049_v8 = vpop.f32.mrb[31].mxu1 }
 0x13b   :  { %v1367_v59 = vsel %vm1350_vm1, %v1364_v36, %v1366_v53  ;;  %v1561_v49 = vsel %vm1544_vm2, %v1558_v39, %v1560_v37  ;;  %v1013_v62 = vadd.f32 %v3554_v20, %v627_v9  ;;  %v629_v55 = vpop.f32.mrb[19].mxu0  ;;  %891 = vmatmul.mubr.f32.gmra.mrb[124].mxu0 %v265_v48  ;;  %v20_v20 = vld [vmem:[%s4195_s1 + $0x18] sm:$0xff] }
 0x13c   :  { %v1745_v2 = vmax.f32 %v1367_v59, %v1561_v49  ;;  %895 = vmatprep.mubr.f32.mxu0 %v270_v50  ;;  %v1870_v4 = vmax.f32 %v1807_v41, %v1808_v43  ;;  %v3673_v27 = vpop.f32.mrb[32].mxu1 }
 0x13d   :  { %v1368_v6 = vrot.slane %v1013_v62, 1  ;;  %v1562_v7 = vrot.slane %v1013_v62, 2  ;;  %v1054_v31 = vpop.f32.mrb[33].mxu1 }
 0x13e   :  { %v1809_v10 = vmax.f32 %v1003_v29, %v1745_v2  ;;  %v632_v11 = vpop.f32.mrb[20].mxu0  ;;  %v3664_v13 = vmax.f32 %v1806_v60, %v1870_v4 }
 0x13f   :  { %v1369_v15 = vsel %vm1350_vm1, %v1366_v53, %v1368_v6  ;;  %v1563_v16 = vsel %vm1544_vm2, %v1560_v37, %v1562_v7  ;;  %v1018_v18 = vadd.f32 %v3575_v38, %v632_v11  ;;  %v634_v19 = vpop.f32.mrb[21].mxu0  ;;  %896 = vmatmul.mubr.f32.gmra.mrb[126].mxu0 %v269_v3 }
 0x140   :  { %v1746_v24 = vmax.f32 %v1369_v15, %v1563_v16  ;;  %2149 = vmatprep.mubr.msk.f32.mxu0 %vm323_vm0, %v20_v20  ;;  %v1871_v28 = vmax.f32 %v1808_v43, %v1809_v10  ;;  %v3680_v0 = vpop.f32.mrb[34].mxu1 }
 0x141   :  { %v1370_v60 = vrot.slane %v1018_v18, 1  ;;  %v1564_v29 = vrot.slane %v1018_v18, 2  ;;  %v1059_v47 = vpop.f32.mrb[35].mxu1 }
 0x142   :  { %v1810_v32 = vmax.f32 %v1008_v46, %v1746_v24  ;;  %v637_v33 = vpop.f32.mrb[22].mxu0  ;;  %v3675_v35 = vmax.f32 %v1807_v41, %v1871_v28 }
 0x143   :  { %v1371_v38 = vsel %vm1350_vm1, %v1368_v6, %v1370_v60  ;;  %v1565_v36 = vsel %vm1544_vm2, %v1562_v7, %v1564_v29  ;;  %v1023_v39 = vadd.f32 %v3589_v30, %v637_v33  ;;  %v639_v12 = vpop.f32.mrb[23].mxu0  ;;  %966 = vmatmul.mubr.f32.vlgmr.msra.gmra.mrb[0].mxu0 %v19_v25 }
 0x144   :  { %v1747_v40 = vmax.f32 %v1371_v38, %v1565_v36  ;;  %v1872_v45 = vmax.f32 %v1809_v10, %v1810_v32  ;;  %v3689_v9 = vpop.f32.mrb[36].mxu1 }
 0x145   :  { %v1372_v23 = vrot.slane %v1023_v39, 1  ;;  %v1566_v46 = vrot.slane %v1023_v39, 2  ;;  %v1064_v2 = vpop.f32.mrb[37].mxu1 }
 0x146   :  { %v1811_v41 = vmax.f32 %v1013_v62, %v1747_v40  ;;  %v642_v48 = vpop.f32.mrb[24].mxu0  ;;  %v3684_v52 = vmax.f32 %v1808_v43, %v1872_v45 }
 0x147   :  { %v1373_v53 = vsel %vm1350_vm1, %v1370_v60, %v1372_v23  ;;  %v1567_v30 = vsel %vm1544_vm2, %v1564_v29, %v1566_v46  ;;  %v1028_v37 = vadd.f32 %v3602_v63, %v642_v48  ;;  %v644_v50 = vpop.f32.mrb[25].mxu0 }
 0x148   :  { %v1748_v57 = vmax.f32 %v1373_v53, %v1567_v30  ;;  %v1873_v59 = vmax.f32 %v1810_v32, %v1811_v41  ;;  %v3696_v8 = vpop.f32.mrb[38].mxu1 }
 0x149   :  { %v1374_v49 = vrot.slane %v1028_v37, 1  ;;  %v1568_v55 = vrot.slane %v1028_v37, 2 }
 0x14a   :  { %v1812_v3 = vmax.f32 %v1018_v18, %v1748_v57  ;;  %v647_v4 = vpop.f32.mrb[26].mxu0  ;;  %v3691_v62 = vmax.f32 %v1809_v10, %v1873_v59  ;;  %v1069_v18 = vpop.f32.mrb[39].mxu1 }
 0x14b   :  { %v1375_v43 = vsel %vm1350_vm1, %v1372_v23, %v1374_v49  ;;  %v1569_v6 = vsel %vm1544_vm2, %v1566_v46, %v1568_v55  ;;  %v1033_v7 = vadd.f32 %v3615_v14, %v647_v4  ;;  %v649_v20 = vpop.f32.mrb[27].mxu0 }
 0x14c   :  { %v1749_v63 = vmax.f32 %v1375_v43, %v1569_v6  ;;  %v1874_v15 = vmax.f32 %v1811_v41, %v1812_v3  ;;  %v3705_v33 = vpop.f32.mrb[40].mxu1 }
 0x14d   :  { %v1376_v16 = vrot.slane %v1033_v7, 1  ;;  %v1570_v19 = vrot.slane %v1033_v7, 2  ;;  %v1074_v40 = vpop.f32.mrb[41].mxu1 }
 0x14e   :  { %v1813_v24 = vmax.f32 %v1023_v39, %v1749_v63  ;;  %v652_v10 = vpop.f32.mrb[28].mxu0  ;;  %v3700_v25 = vmax.f32 %v1810_v32, %v1874_v15 }
 0x14f   :  { %v1377_v28 = vsel %vm1350_vm1, %v1374_v49, %v1376_v16  ;;  %v1571_v60 = vsel %vm1544_vm2, %v1568_v55, %v1570_v19  ;;  %v1038_v14 = vadd.f32 %v3630_v34, %v652_v10  ;;  %v654_v29 = vpop.f32.mrb[29].mxu0 }
 0x150   :  { %v1750_v31 = vmax.f32 %v1377_v28, %v1571_v60  ;;  %v1875_v38 = vmax.f32 %v1812_v3, %v1813_v24  ;;  %v3712_v53 = vpop.f32.mrb[42].mxu1 }
 0x151   :  { %v1378_v36 = vrot.slane %v1038_v14, 1  ;;  %v1572_v12 = vrot.slane %v1038_v14, 2 }
 0x152   :  { %v1814_v45 = vmax.f32 %v1028_v37, %v1750_v31  ;;  %v657_v23 = vpop.f32.mrb[30].mxu0  ;;  %v3707_v39 = vmax.f32 %v1811_v41, %v1875_v38  ;;  %v1079_v37 = vpop.f32.mrb[43].mxu1 }
 0x153   :  { %v1379_v32 = vsel %vm1350_vm1, %v1376_v16, %v1378_v36  ;;  %v1573_v46 = vsel %vm1544_vm2, %v1570_v19, %v1572_v12  ;;  %v1043_v47 = vadd.f32 %v3644_v51, %v657_v23  ;;  %v659_v48 = vpop.f32.mrb[31].mxu0 }
 0x154   :  { %v1751_v34 = vmax.f32 %v1379_v32, %v1573_v46  ;;  %v1876_v50 = vmax.f32 %v1813_v24, %v1814_v45  ;;  %v3721_v20 = vpop.f32.mrb[44].mxu1 }
 0x155   :  { %v1380_v57 = vrot.slane %v1043_v47, 1  ;;  %v1574_v59 = vrot.slane %v1043_v47, 2  ;;  %v1084_v19 = vpop.f32.mrb[45].mxu1 }
 0x156   :  { %v1815_v49 = vmax.f32 %v1033_v7, %v1751_v34  ;;  %v662_v41 = vpop.f32.mrb[32].mxu0  ;;  %v3716_v55 = vmax.f32 %v1812_v3, %v1876_v50 }
 0x157   :  { %v1381_v2 = vsel %vm1350_vm1, %v1378_v36, %v1380_v57  ;;  %v1575_v4 = vsel %vm1544_vm2, %v1572_v12, %v1574_v59  ;;  %v1048_v51 = vadd.f32 %v3657_v54, %v662_v41  ;;  %v664_v43 = vpop.f32.mrb[33].mxu0 }
 0x158   :  { %v1752_v6 = vmax.f32 %v1381_v2, %v1575_v4  ;;  %v1877_v63 = vmax.f32 %v1814_v45, %v1815_v49  ;;  %v3728_v31 = vpop.f32.mrb[46].mxu1 }
 0x159   :  { %v1382_v15 = vrot.slane %v1048_v51, 1  ;;  %v1576_v16 = vrot.slane %v1048_v51, 2 }
 0x15a   :  { %v1816_v18 = vmax.f32 %v1038_v14, %v1752_v6  ;;  %v667_v10 = vpop.f32.mrb[34].mxu0  ;;  %v3723_v7 = vmax.f32 %v1813_v24, %v1877_v63  ;;  %v1089_v14 = vpop.f32.mrb[47].mxu1 }
 0x15b   :  { %v1383_v3 = vsel %vm1350_vm1, %v1380_v57, %v1382_v15  ;;  %v1577_v28 = vsel %vm1544_vm2, %v1574_v59, %v1576_v16  ;;  %v1053_v60 = vadd.f32 %v3673_v27, %v667_v10  ;;  %v669_v29 = vpop.f32.mrb[35].mxu0 }
 0x15c   :  { %v1753_v54 = vmax.f32 %v1383_v3, %v1577_v28  ;;  %v1878_v36 = vmax.f32 %v1815_v49, %v1816_v18  ;;  %v3737_v57 = vpop.f32.mrb[48].mxu1 }
 0x15d   :  { %v1384_v12 = vrot.slane %v1053_v60, 1  ;;  %v1578_v40 = vrot.slane %v1053_v60, 2  ;;  %v1094_v2 = vpop.f32.mrb[49].mxu1 }
 0x15e   :  { %v1817_v23 = vmax.f32 %v1043_v47, %v1753_v54  ;;  %v672_v24 = vpop.f32.mrb[36].mxu0  ;;  %v3732_v32 = vmax.f32 %v1814_v45, %v1878_v36 }
 0x15f   :  { %v1385_v46 = vsel %vm1350_vm1, %v1382_v15, %v1384_v12  ;;  %v1579_v48 = vsel %vm1544_vm2, %v1576_v16, %v1578_v40  ;;  %v1058_v27 = vadd.f32 %v3680_v0, %v672_v24  ;;  %v674_v34 = vpop.f32.mrb[37].mxu0 }
 0x160   :  { %v1754_v50 = vmax.f32 %v1385_v46, %v1579_v48  ;;  %v1879_v59 = vmax.f32 %v1816_v18, %v1817_v23  ;;  %v3744_v16 = vpop.f32.mrb[50].mxu1 }
 0x161   :  { %v1386_v37 = vrot.slane %v1058_v27, 1  ;;  %v1580_v41 = vrot.slane %v1058_v27, 2  ;;  %v1099_v29 = vpop.f32.mrb[51].mxu1 }
 0x162   :  { %v677_v4 = vpop.f32.mrb[38].mxu0  ;;  %v1818_v43 = vmax.f32 %v1048_v51, %v1754_v50  ;;  %v3739_v47 = vmax.f32 %v1815_v49, %v1879_v59 }
 0x163   :  { %v1387_v45 = vsel %vm1350_vm1, %v1384_v12, %v1386_v37  ;;  %v1581_v6 = vsel %vm1544_vm2, %v1578_v40, %v1580_v41  ;;  %v1063_v63 = vadd.f32 %v3689_v9, %v677_v4  ;;  %v679_v15 = vpop.f32.mrb[39].mxu0 }
 0x164   :  { %v1755_v0 = vmax.f32 %v1387_v45, %v1581_v6  ;;  %v1880_v10 = vmax.f32 %v1817_v23, %v1818_v43  ;;  %v3753_v24 = vpop.f32.mrb[52].mxu1 }
 0x165   :  { %v1388_v3 = vrot.slane %v1063_v63, 1  ;;  %v1582_v28 = vrot.slane %v1063_v63, 2  ;;  %v1104_v50 = vpop.f32.mrb[53].mxu1 }
 0x166   :  { %v682_v51 = vpop.f32.mrb[40].mxu0  ;;  %v1819_v49 = vmax.f32 %v1053_v60, %v1755_v0  ;;  %v3748_v54 = vmax.f32 %v1816_v18, %v1880_v10 }
 0x167   :  { %v1389_v36 = vsel %vm1350_vm1, %v1386_v37, %v1388_v3  ;;  %v1583_v12 = vsel %vm1544_vm2, %v1580_v41, %v1582_v28  ;;  %v1068_v9 = vadd.f32 %v3696_v8, %v682_v51  ;;  %v684_v40 = vpop.f32.mrb[41].mxu0 }
 0x168   :  { %4224 = vst [vmem:[#allocation2_spill] sm:$0xff] %v3748_v54  ;;  %v1756_v14 = vmax.f32 %v1389_v36, %v1583_v12  ;;  %v1881_v46 = vmax.f32 %v1818_v43, %v1819_v49  ;;  %v3760_v6 = vpop.f32.mrb[54].mxu1 }
 0x169   :  { %v1390_v48 = vrot.slane %v1068_v9, 1  ;;  %v1584_v34 = vrot.slane %v1068_v9, 2  ;;  %v1109_v29 = vpop.f32.mrb[55].mxu1 }
 0x16a   :  { %v687_v59 = vpop.f32.mrb[42].mxu0  ;;  %v1820_v2 = vmax.f32 %v1058_v27, %v1756_v14  ;;  %v3755_v4 = vmax.f32 %v1817_v23, %v1881_v46 }
 0x16b   :  { %v1391_v18 = vsel %vm1350_vm1, %v1388_v3, %v1390_v48  ;;  %v1585_v60 = vsel %vm1544_vm2, %v1582_v28, %v1584_v34  ;;  %v1073_v37 = vadd.f32 %v3705_v33, %v687_v59  ;;  %v689_v41 = vpop.f32.mrb[43].mxu0 }
 0x16c   :  { %4225 = vst [vmem:[#allocation3_spill] sm:$0xff] %v3755_v4  ;;  %v1757_v8 = vmax.f32 %v1391_v18, %v1585_v60  ;;  %v1882_v45 = vmax.f32 %v1819_v49, %v1820_v2  ;;  %v3767_v14 = vpop.f32.mrb[56].mxu1 }
 0x16d   :  { %v1392_v0 = vrot.slane %v1073_v37, 1  ;;  %v1586_v10 = vrot.slane %v1073_v37, 2  ;;  %v1114_v59 = vpop.f32.mrb[57].mxu1 }
 0x16e   :  { %v692_v27 = vpop.f32.mrb[44].mxu0  ;;  %v1821_v23 = vmax.f32 %v1063_v63, %v1757_v8  ;;  %v1946_v51 = vmax.f32 %v1818_v43, %v1882_v45 }
 0x16f   :  { %v1393_v3 = vsel %vm1350_vm1, %v1390_v48, %v1392_v0  ;;  %v1587_v28 = vsel %vm1544_vm2, %v1584_v34, %v1586_v10  ;;  %v1078_v33 = vadd.f32 %v3712_v53, %v692_v27  ;;  %v694_v36 = vpop.f32.mrb[45].mxu0 }
 0x170   :  { %v1758_v12 = vmax.f32 %v1393_v3, %v1587_v28  ;;  %v1883_v40 = vmax.f32 %v1820_v2, %v1821_v23  ;;  %v3772_v45 = vpop.f32.mrb[58].mxu1 }
 0x171   :  { %v1394_v46 = vrot.slane %v1078_v33, 1  ;;  %v1588_v50 = vrot.slane %v1078_v33, 2  ;;  %v1119_v28 = vpop.f32.mrb[59].mxu1 }
 0x172   :  { %v697_v18 = vpop.f32.mrb[46].mxu0  ;;  %v1947_v60 = vmax.f32 %v1819_v49, %v1883_v40  ;;  %v1822_v41 = vmax.f32 %v1068_v9, %v1758_v12 }
 0x173   :  { %v1395_v63 = vsel %vm1350_vm1, %v1392_v0, %v1394_v46  ;;  %v1589_v43 = vsel %vm1544_vm2, %v1586_v10, %v1588_v50  ;;  %v1083_v48 = vadd.f32 %v3721_v20, %v697_v18  ;;  %v699_v34 = vpop.f32.mrb[47].mxu0 }
 0x174   :  { %v1759_v8 = vmax.f32 %v1395_v63, %v1589_v43  ;;  %v2358_v53 = vpack.c.bf16 %v1947_v60, %v1946_v51  ;;  %v1884_v29 = vmax.f32 %v1821_v23, %v1822_v41  ;;  %v3779_v51 = vpop.f32.mrb[60].mxu1 }
 0x175   :  { %v1396_v27 = vrot.slane %v1083_v48, 1  ;;  %v1590_v3 = vrot.slane %v1083_v48, 2  ;;  %v1124_v63 = vpop.f32.mrb[61].mxu1 }
 0x176   :  { %v702_v36 = vpop.f32.mrb[48].mxu0  ;;  %2359 = vmatprep.subr.bf16.mxu1 %v2358_v53  ;;  %v1823_v59 = vmax.f32 %v1073_v37, %v1759_v8  ;;  %v3774_v49 = vmax.f32 %v1820_v2, %v1884_v29 }
 0x177   :  { %v1397_v9 = vsel %vm1350_vm1, %v1394_v46, %v1396_v27  ;;  %v1591_v0 = vsel %vm1544_vm2, %v1588_v50, %v1590_v3  ;;  %v1088_v20 = vadd.f32 %v3728_v31, %v702_v36  ;;  %v704_v10 = vpop.f32.mrb[49].mxu0 }
 0x178   :  { %v1760_v12 = vmax.f32 %v1397_v9, %v1591_v0  ;;  %v1885_v40 = vmax.f32 %v1822_v41, %v1823_v59  ;;  %v3786_v53 = vpop.f32.mrb[62].mxu1 }
 0x179   :  { %v1398_v18 = vrot.slane %v1088_v20, 1  ;;  %v1592_v60 = vrot.slane %v1088_v20, 2  ;;  %v1129_v0 = vpop.f32.mrb[63].mxu1 }
 0x17a   :  { %v707_v43 = vpop.f32.mrb[50].mxu0  ;;  %v3781_v34 = vmax.f32 %v1821_v23, %v1885_v40  ;;  %v1824_v37 = vmax.f32 %v1078_v33, %v1760_v12 }
 0x17b   :  { %v1399_v2 = vsel %vm1350_vm1, %v1396_v27, %v1398_v18  ;;  %v1593_v46 = vsel %vm1544_vm2, %v1590_v3, %v1592_v60  ;;  %v1093_v50 = vadd.f32 %v3737_v57, %v707_v43  ;;  %v709_v8 = vpop.f32.mrb[51].mxu0 }
 0x17c   :  { %v1761_v31 = vmax.f32 %v1399_v2, %v1593_v46  ;;  %v1886_v28 = vmax.f32 %v1823_v59, %v1824_v37  ;;  %v3795_v63 = vpop.f32.mrb[64].mxu1 }
 0x17d   :  { %v1400_v36 = vrot.slane %v1093_v50, 1  ;;  %v1594_v9 = vrot.slane %v1093_v50, 2  ;;  %v1134_v8 = vpop.f32.mrb[65].mxu1 }
 0x17e   :  { %v712_v23 = vpop.f32.mrb[52].mxu0  ;;  %v1825_v10 = vmax.f32 %v1083_v48, %v1761_v31  ;;  %v3790_v33 = vmax.f32 %v1822_v41, %v1886_v28 }
 0x17f   :  { %v1401_v27 = vsel %vm1350_vm1, %v1398_v18, %v1400_v36  ;;  %v1595_v3 = vsel %vm1544_vm2, %v1592_v60, %v1594_v9  ;;  %v1098_v57 = vadd.f32 %v3744_v16, %v712_v23  ;;  %v714_v12 = vpop.f32.mrb[53].mxu0 }
 0x180   :  { %v1762_v40 = vmax.f32 %v1401_v27, %v1595_v3  ;;  %v1887_v43 = vmax.f32 %v1824_v37, %v1825_v10  ;;  %v3802_v28 = vpop.f32.mrb[66].mxu1 }
 0x181   :  { %v1402_v2 = vrot.slane %v1098_v57, 1  ;;  %v1596_v46 = vrot.slane %v1098_v57, 2  ;;  %v1139_v8 = vpop.f32.mrb[67].mxu1 }
 0x182   :  { %v717_v15 = vpop.f32.mrb[54].mxu0  ;;  %v3797_v0 = vmax.f32 %v1823_v59, %v1887_v43  ;;  %v1826_v48 = vmax.f32 %v1088_v20, %v1762_v40 }
 0x183   :  { %v1403_v41 = vsel %vm1350_vm1, %v1400_v36, %v1402_v2  ;;  %v1597_v18 = vsel %vm1544_vm2, %v1594_v9, %v1596_v46  ;;  %v1103_v60 = vadd.f32 %v3753_v24, %v717_v15  ;;  %v719_v31 = vpop.f32.mrb[55].mxu0 }
 0x184   :  { %v1763_v16 = vmax.f32 %v1403_v41, %v1597_v18  ;;  %v1888_v27 = vmax.f32 %v1825_v10, %v1826_v48  ;;  %v3811_v41 = vpop.f32.mrb[68].mxu1 }
 0x185   :  { %v1404_v3 = vrot.slane %v1103_v60, 1  ;;  %v1598_v12 = vrot.slane %v1103_v60, 2  ;;  %v1144_v38 = vpop.f32.mrb[69].mxu1 }
 0x186   :  { %v722_v59 = vpop.f32.mrb[56].mxu0  ;;  %v1827_v43 = vmax.f32 %v1093_v50, %v1763_v16  ;;  %v3806_v20 = vmax.f32 %v1824_v37, %v1888_v27 }
 0x187   :  { %v1405_v36 = vsel %vm1350_vm1, %v1402_v2, %v1404_v3  ;;  %v1599_v9 = vsel %vm1544_vm2, %v1596_v46, %v1598_v12  ;;  %v1108_v24 = vadd.f32 %v3760_v6, %v722_v59  ;;  %v724_v15 = vpop.f32.mrb[57].mxu0 }
 0x188   :  { %v1764_v40 = vmax.f32 %v1405_v36, %v1599_v9  ;;  %v1889_v18 = vmax.f32 %v1826_v48, %v1827_v43  ;;  %v3818_v27 = vpop.f32.mrb[70].mxu1 }
 0x189   :  { %v1406_v31 = vrot.slane %v1108_v24, 1  ;;  %v1600_v19 = vrot.slane %v1108_v24, 2  ;;  %v1149_v15 = vpop.f32.mrb[71].mxu1 }
 0x18a   :  { %v727_v30 = vpop.f32.mrb[58].mxu0  ;;  %v3813_v8 = vmax.f32 %v1825_v10, %v1889_v18  ;;  %v1828_v50 = vmax.f32 %v1098_v57, %v1764_v40 }
 0x18b   :  { %v1407_v37 = vsel %vm1350_vm1, %v1404_v3, %v1406_v31  ;;  %v1601_v2 = vsel %vm1544_vm2, %v1598_v12, %v1600_v19  ;;  %v1113_v46 = vadd.f32 %v3767_v14, %v727_v30  ;;  %v729_v16 = vpop.f32.mrb[59].mxu0 }
 0x18c   :  { %v1765_v6 = vmax.f32 %v1407_v37, %v1601_v2  ;;  %v1890_v36 = vmax.f32 %v1827_v43, %v1828_v50  ;;  %v3827_v37 = vpop.f32.mrb[72].mxu1 }
 0x18d   :  { %v1408_v9 = vrot.slane %v1113_v46, 1  ;;  %v1602_v38 = vrot.slane %v1113_v46, 2  ;;  %v1154_v59 = vpop.f32.mrb[73].mxu1 }
 0x18e   :  { %v732_v10 = vpop.f32.mrb[60].mxu0  ;;  %v1829_v18 = vmax.f32 %v1103_v60, %v1765_v6  ;;  %v3822_v57 = vmax.f32 %v1826_v48, %v1890_v36 }
 0x18f   :  { %v1409_v3 = vsel %vm1350_vm1, %v1406_v31, %v1408_v9  ;;  %v1603_v12 = vsel %vm1544_vm2, %v1600_v19, %v1602_v38  ;;  %v1118_v30 = vadd.f32 %v3772_v45, %v732_v10  ;;  %v734_v14 = vpop.f32.mrb[61].mxu0 }
 0x190   :  { %v1766_v40 = vmax.f32 %v1409_v3, %v1603_v12  ;;  %v1891_v2 = vmax.f32 %v1828_v50, %v1829_v18  ;;  %v3834_v36 = vpop.f32.mrb[74].mxu1 }
 0x191   :  { %v1410_v16 = vrot.slane %v1118_v30, 1  ;;  %v1604_v11 = vrot.slane %v1118_v30, 2  ;;  %v1159_v14 = vpop.f32.mrb[75].mxu1 }
 0x192   :  { %v737_v44 = vpop.f32.mrb[62].mxu0  ;;  %v3829_v15 = vmax.f32 %v1827_v43, %v1891_v2  ;;  %v1830_v60 = vmax.f32 %v1108_v24, %v1766_v40 }
 0x193   :  { %v1411_v48 = vsel %vm1350_vm1, %v1408_v9, %v1410_v16  ;;  %v1605_v31 = vsel %vm1544_vm2, %v1602_v38, %v1604_v11  ;;  %v1123_v19 = vadd.f32 %v3779_v51, %v737_v44  ;;  %v739_v6 = vpop.f32.mrb[63].mxu0 }
 0x194   :  { %v1767_v45 = vmax.f32 %v1411_v48, %v1605_v31  ;;  %v1892_v3 = vmax.f32 %v1829_v18, %v1830_v60  ;;  %v3843_v48 = vpop.f32.mrb[76].mxu1 }
 0x195   :  { %v1412_v12 = vrot.slane %v1123_v19, 1  ;;  %v1606_v59 = vrot.slane %v1123_v19, 2  ;;  %v1164_v23 = vpop.f32.mrb[77].mxu1 }
 0x196   :  { %v742_v43 = vpop.f32.mrb[64].mxu0  ;;  %v1831_v2 = vmax.f32 %v1113_v46, %v1767_v45  ;;  %v3838_v24 = vmax.f32 %v1828_v50, %v1892_v3 }
 0x197   :  { %v1413_v9 = vsel %vm1350_vm1, %v1410_v16, %v1412_v12  ;;  %v1607_v38 = vsel %vm1544_vm2, %v1604_v11, %v1606_v59  ;;  %v1128_v44 = vadd.f32 %v3786_v53, %v742_v43  ;;  %v744_v51 = vpop.f32.mrb[65].mxu0 }
 0x198   :  { %v1768_v40 = vmax.f32 %v1413_v9, %v1607_v38  ;;  %v1893_v31 = vmax.f32 %v1830_v60, %v1831_v2  ;;  %v3850_v3 = vpop.f32.mrb[78].mxu1 }
 0x199   :  { %v1414_v6 = vrot.slane %v1128_v44, 1  ;;  %v1608_v10 = vrot.slane %v1128_v44, 2  ;;  %v1169_v51 = vpop.f32.mrb[79].mxu1 }
 0x19a   :  { %v747_v61 = vpop.f32.mrb[66].mxu0  ;;  %v3845_v14 = vmax.f32 %v1829_v18, %v1893_v31  ;;  %v1832_v46 = vmax.f32 %v1118_v30, %v1768_v40 }
 0x19b   :  { %v1415_v50 = vsel %vm1350_vm1, %v1412_v12, %v1414_v6  ;;  %v1609_v16 = vsel %vm1544_vm2, %v1606_v59, %v1608_v10  ;;  %v1133_v11 = vadd.f32 %v3795_v63, %v747_v61  ;;  %v749_v45 = vpop.f32.mrb[67].mxu0 }
 0x19c   :  { %v1769_v53 = vmax.f32 %v1415_v50, %v1609_v16  ;;  %v1894_v9 = vmax.f32 %v1831_v2, %v1832_v46  ;;  %v3859_v50 = vpop.f32.mrb[80].mxu1 }
 0x19d   :  { %v1416_v38 = vrot.slane %v1133_v11, 1  ;;  %v1610_v23 = vrot.slane %v1133_v11, 2  ;;  %v1174_v29 = vpop.f32.mrb[81].mxu1 }
 0x19e   :  { %v752_v18 = vpop.f32.mrb[68].mxu0  ;;  %v1833_v31 = vmax.f32 %v1123_v19, %v1769_v53  ;;  %v3854_v30 = vmax.f32 %v1830_v60, %v1894_v9 }
 0x19f   :  { %v1417_v12 = vsel %vm1350_vm1, %v1414_v6, %v1416_v38  ;;  %v1611_v59 = vsel %vm1544_vm2, %v1608_v10, %v1610_v23  ;;  %v1138_v61 = vadd.f32 %v3802_v28, %v752_v18  ;;  %v754_v63 = vpop.f32.mrb[69].mxu0 }
 0x1a0   :  { %v1770_v40 = vmax.f32 %v1417_v12, %v1611_v59  ;;  %v1895_v16 = vmax.f32 %v1832_v46, %v1833_v31  ;;  %v3866_v9 = vpop.f32.mrb[82].mxu1 }
 0x1a1   :  { %v1418_v45 = vrot.slane %v1138_v61, 1  ;;  %v1612_v43 = vrot.slane %v1138_v61, 2  ;;  %v1179_v63 = vpop.f32.mrb[83].mxu1 }
 0x1a2   :  { %v757_v1 = vpop.f32.mrb[70].mxu0  ;;  %v3861_v51 = vmax.f32 %v1831_v2, %v1895_v16  ;;  %v1834_v19 = vmax.f32 %v1128_v44, %v1770_v40 }
 0x1a3   :  { %v1419_v60 = vsel %vm1350_vm1, %v1416_v38, %v1418_v45  ;;  %v1613_v6 = vsel %vm1544_vm2, %v1610_v23, %v1612_v43  ;;  %v1143_v10 = vadd.f32 %v3811_v41, %v757_v1  ;;  %v759_v53 = vpop.f32.mrb[71].mxu0 }
 0x1a4   :  { %v1771_v28 = vmax.f32 %v1419_v60, %v1613_v6  ;;  %v1896_v12 = vmax.f32 %v1833_v31, %v1834_v19  ;;  %v3875_v60 = vpop.f32.mrb[84].mxu1 }
 0x1a5   :  { %v1420_v59 = vrot.slane %v1143_v10, 1  ;;  %v1614_v29 = vrot.slane %v1143_v10, 2  ;;  %v1184_v22 = vpop.f32.mrb[85].mxu1 }
 0x1a6   :  { %v762_v2 = vpop.f32.mrb[72].mxu0  ;;  %v1835_v16 = vmax.f32 %v1133_v11, %v1771_v28  ;;  %v3870_v44 = vmax.f32 %v1832_v46, %v1896_v12 }
 0x1a7   :  { %v1421_v38 = vsel %vm1350_vm1, %v1418_v45, %v1420_v59  ;;  %v1615_v23 = vsel %vm1544_vm2, %v1612_v43, %v1614_v29  ;;  %v1148_v1 = vadd.f32 %v3818_v27, %v762_v2  ;;  %v764_v41 = vpop.f32.mrb[73].mxu0 }
 0x1a8   :  { %4226 = vst [vmem:[#allocation4_spill] sm:$0xff] %v3870_v44  ;;  %v1772_v40 = vmax.f32 %v1421_v38, %v1615_v23  ;;  %v1897_v6 = vmax.f32 %v1834_v19, %v1835_v16  ;;  %v3882_v28 = vpop.f32.mrb[86].mxu1 }
 0x1a9   :  { %v1422_v53 = vrot.slane %v1148_v1, 1  ;;  %v1616_v18 = vrot.slane %v1148_v1, 2 }
 0x1aa   :  { %v1836_v21 = vmax.f32 %v1138_v61, %v1772_v40  ;;  %v767_v63 = vpop.f32.mrb[74].mxu0  ;;  %v3877_v54 = vmax.f32 %v1833_v31, %v1897_v6  ;;  %v1189_v61 = vpop.f32.mrb[87].mxu1 }
 0x1ab   :  { %v1423_v46 = vsel %vm1350_vm1, %v1420_v59, %v1422_v53  ;;  %v1617_v11 = vsel %vm1544_vm2, %v1614_v29, %v1616_v18  ;;  %v1153_v43 = vadd.f32 %v3827_v37, %v767_v63  ;;  %v769_v45 = vpop.f32.mrb[75].mxu0 }
 0x1ac   :  { %v1773_v27 = vmax.f32 %v1423_v46, %v1617_v11  ;;  %v1898_v2 = vmax.f32 %v1835_v16, %v1836_v21  ;;  %v3891_v63 = vpop.f32.mrb[88].mxu1 }
 0x1ad   :  { %v1424_v38 = vrot.slane %v1153_v43, 1  ;;  %v1618_v22 = vrot.slane %v1153_v43, 2  ;;  %v1194_v12 = vpop.f32.mrb[89].mxu1 }
 0x1ae   :  { %v1837_v23 = vmax.f32 %v1143_v10, %v1773_v27  ;;  %v772_v31 = vpop.f32.mrb[76].mxu0  ;;  %v3886_v41 = vmax.f32 %v1834_v19, %v1898_v2 }
 0x1af   :  { %v1425_v59 = vsel %vm1350_vm1, %v1422_v53, %v1424_v38  ;;  %v1619_v29 = vsel %vm1544_vm2, %v1616_v18, %v1618_v22  ;;  %v1158_v37 = vadd.f32 %v3834_v36, %v772_v31  ;;  %v774_v40 = vpop.f32.mrb[77].mxu0 }
 0x1b0   :  { %4227 = vst [vmem:[#allocation5_spill] sm:$0xff] %v3886_v41  ;;  %v1774_v6 = vmax.f32 %v1425_v59, %v1619_v29  ;;  %v1899_v46 = vmax.f32 %v1836_v21, %v1837_v23  ;;  %v3898_v2 = vpop.f32.mrb[90].mxu1 }
 0x1b1   :  { %v1426_v11 = vrot.slane %v1158_v37, 1  ;;  %v1620_v45 = vrot.slane %v1158_v37, 2 }
 0x1b2   :  { %v1838_v4 = vmax.f32 %v1148_v1, %v1774_v6  ;;  %v777_v61 = vpop.f32.mrb[78].mxu0  ;;  %v3893_v10 = vmax.f32 %v1835_v16, %v1899_v46  ;;  %v1199_v1 = vpop.f32.mrb[91].mxu1 }
 0x1b3   :  { %v1427_v19 = vsel %vm1350_vm1, %v1424_v38, %v1426_v11  ;;  %v1621_v53 = vsel %vm1544_vm2, %v1618_v22, %v1620_v45  ;;  %v1163_v18 = vadd.f32 %v3843_v48, %v777_v61  ;;  %v779_v27 = vpop.f32.mrb[79].mxu0 }
 0x1b4   :  { %4228 = vst [vmem:[#allocation6_spill] sm:$0xff] %v3893_v10  ;;  %v1775_v36 = vmax.f32 %v1427_v19, %v1621_v53  ;;  %v1900_v59 = vmax.f32 %v1837_v23, %v1838_v4  ;;  %v3907_v19 = vpop.f32.mrb[92].mxu1 }
 0x1b5   :  { %v1428_v29 = vrot.slane %v1163_v18, 1  ;;  %v1622_v12 = vrot.slane %v1163_v18, 2  ;;  %v1204_v41 = vpop.f32.mrb[93].mxu1 }
 0x1b6   :  { %v1839_v40 = vmax.f32 %v1153_v43, %v1775_v36  ;;  %v782_v16 = vpop.f32.mrb[80].mxu0  ;;  %v3902_v6 = vmax.f32 %v1836_v21, %v1900_v59 }
 0x1b7   :  { %v1429_v38 = vsel %vm1350_vm1, %v1426_v11, %v1428_v29  ;;  %v1623_v22 = vsel %vm1544_vm2, %v1620_v45, %v1622_v12  ;;  %v1168_v48 = vadd.f32 %v3850_v3, %v782_v16  ;;  %v784_v46 = vpop.f32.mrb[81].mxu0 }
 0x1b8   :  { %4229 = vst [vmem:[#allocation7_spill] sm:$0xff] %v3902_v6  ;;  %v1776_v61 = vmax.f32 %v1429_v38, %v1623_v22  ;;  %v1901_v53 = vmax.f32 %v1838_v4, %v1839_v40  ;;  %v3914_v59 = vpop.f32.mrb[94].mxu1 }
 0x1b9   :  { %v1430_v27 = vrot.slane %v1168_v48, 1  ;;  %v1624_v31 = vrot.slane %v1168_v48, 2 }
 0x1ba   :  { %v1840_v10 = vmax.f32 %v1158_v37, %v1776_v61  ;;  %v787_v1 = vpop.f32.mrb[82].mxu0  ;;  %v3909_v43 = vmax.f32 %v1837_v23, %v1901_v53  ;;  %v1209_v37 = vpop.f32.mrb[95].mxu1 }
 0x1bb   :  { %v1431_v21 = vsel %vm1350_vm1, %v1428_v29, %v1430_v27  ;;  %v1625_v11 = vsel %vm1544_vm2, %v1622_v12, %v1624_v31  ;;  %v1173_v45 = vadd.f32 %v3859_v50, %v787_v1  ;;  %v789_v36 = vpop.f32.mrb[83].mxu0  ;;  %v1995_v1 = vld [vmem:[%s4196_s2 + $0x8] sm:$0xff] }
 0x1bc   :  { %4230 = vst [vmem:[#allocation8_spill] sm:$0xff] %v3909_v43  ;;  %v1777_v3 = vmax.f32 %v1431_v21, %v1625_v11  ;;  %v1902_v38 = vmax.f32 %v1839_v40, %v1840_v10  ;;  %v3926_v11 = vpop.f32.mrb[96].mxu1  ;;  %2068 = vmatprep.mubr.f32.mxu1 %v1995_v1 }
 0x1bd   :  { %v1432_v22 = vrot.slane %v1173_v45, 1  ;;  %v1626_v41 = vrot.slane %v1173_v45, 2 }
 0x1be   :  { %v1841_v46 = vmax.f32 %v1163_v18, %v1777_v3  ;;  %v792_v23 = vpop.f32.mrb[84].mxu0  ;;  %v3918_v61 = vmax.f32 %v1838_v4, %v1902_v38  ;;  %v1214_v4 = vpop.f32.mrb[97].mxu1 }
 0x1bf   :  { %v1433_v29 = vsel %vm1350_vm1, %v1430_v27, %v1432_v22  ;;  %v1627_v12 = vsel %vm1544_vm2, %v1624_v31, %v1626_v41  ;;  %v1178_v50 = vadd.f32 %v3866_v9, %v792_v23  ;;  %v794_v53 = vpop.f32.mrb[85].mxu0 }
 0x1c0   :  { %4231 = vst [vmem:[#allocation9_spill] sm:$0xff] %v3918_v61  ;;  %v1778_v21 = vmax.f32 %v1433_v29, %v1627_v12  ;;  %v1903_v36 = vmax.f32 %v1840_v10, %v1841_v46  ;;  %v3933_v29 = vpop.f32.mrb[98].mxu1 }
 0x1c1   :  { %v1434_v18 = vrot.slane %v1178_v50, 1  ;;  %v1628_v3 = vrot.slane %v1178_v50, 2 }
 0x1c2   :  { %v1842_v38 = vmax.f32 %v1168_v48, %v1778_v21  ;;  %v797_v37 = vpop.f32.mrb[86].mxu0  ;;  %v3928_v27 = vmax.f32 %v1839_v40, %v1903_v36  ;;  %v1219_v48 = vpop.f32.mrb[99].mxu1 }
 0x1c3   :  { %v1435_v31 = vsel %vm1350_vm1, %v1432_v22, %v1434_v18  ;;  %v1629_v9 = vsel %vm1544_vm2, %v1626_v41, %v1628_v3  ;;  %v1183_v23 = vadd.f32 %v3875_v60, %v797_v37  ;;  %v799_v53 = vpop.f32.mrb[87].mxu0 }
 0x1c4   :  { %4232 = vst [vmem:[#allocation10_spill] sm:$0xff] %v3928_v27  ;;  %v1779_v16 = vmax.f32 %v1435_v31, %v1629_v9  ;;  %v1904_v1 = vmax.f32 %v1841_v46, %v1842_v38  ;;  %v3942_v9 = vpop.f32.mrb[100].mxu1 }
 0x1c5   :  { %v1436_v6 = vrot.slane %v1183_v23, 1  ;;  %v1630_v4 = vrot.slane %v1183_v23, 2  ;;  %v1224_v27 = vpop.f32.mrb[101].mxu1 }
 0x1c6   :  { %v1843_v21 = vmax.f32 %v1173_v45, %v1779_v16  ;;  %v802_v40 = vpop.f32.mrb[88].mxu0  ;;  %v3937_v36 = vmax.f32 %v1840_v10, %v1904_v1 }
 0x1c7   :  { %v1437_v22 = vsel %vm1350_vm1, %v1434_v18, %v1436_v6  ;;  %v1631_v41 = vsel %vm1544_vm2, %v1628_v3, %v1630_v4  ;;  %v1188_v60 = vadd.f32 %v3882_v28, %v802_v40  ;;  %v804_v37 = vpop.f32.mrb[89].mxu0 }
 0x1c8   :  { %4233 = vst [vmem:[#allocation11_spill] sm:$0xff] %v3937_v36  ;;  %v1780_v31 = vmax.f32 %v1437_v22, %v1631_v41  ;;  %v1905_v53 = vmax.f32 %v1842_v38, %v1843_v21  ;;  %v3949_v1 = vpop.f32.mrb[102].mxu1 }
 0x1c9   :  { %v1438_v12 = vrot.slane %v1188_v60, 1  ;;  %v1632_v61 = vrot.slane %v1188_v60, 2 }
 0x1ca   :  { %v1844_v43 = vmax.f32 %v1178_v50, %v1780_v31  ;;  %v807_v48 = vpop.f32.mrb[90].mxu0  ;;  %v3944_v45 = vmax.f32 %v1841_v46, %v1905_v53  ;;  %v1229_v50 = vpop.f32.mrb[103].mxu1 }
 0x1cb   :  { %v1439_v10 = vsel %vm1350_vm1, %v1436_v6, %v1438_v12  ;;  %v1633_v16 = vsel %vm1544_vm2, %v1630_v4, %v1632_v61  ;;  %v1193_v18 = vadd.f32 %v3891_v63, %v807_v48  ;;  %v809_v3 = vpop.f32.mrb[91].mxu0 }
 0x1cc   :  { %4234 = vst [vmem:[#allocation12_spill] sm:$0xff] %v3944_v45  ;;  %v1781_v28 = vmax.f32 %v1439_v10, %v1633_v16  ;;  %v1906_v22 = vmax.f32 %v1843_v21, %v1844_v43  ;;  %v3958_v10 = vpop.f32.mrb[104].mxu1 }
 0x1cd   :  { %v1440_v41 = vrot.slane %v1193_v18, 1  ;;  %v1634_v27 = vrot.slane %v1193_v18, 2  ;;  %v1234_v36 = vpop.f32.mrb[105].mxu1 }
 0x1ce   :  { %v1845_v37 = vmax.f32 %v1183_v23, %v1781_v28  ;;  %v812_v46 = vpop.f32.mrb[92].mxu0  ;;  %v3953_v31 = vmax.f32 %v1842_v38, %v1906_v22 }
 0x1cf   :  { %v1441_v6 = vsel %vm1350_vm1, %v1438_v12, %v1440_v41  ;;  %v1635_v4 = vsel %vm1544_vm2, %v1632_v61, %v1634_v27  ;;  %v1198_v63 = vadd.f32 %v3898_v2, %v812_v46  ;;  %v814_v53 = vpop.f32.mrb[93].mxu0 }
 0x1d0   :  { %4235 = vst [vmem:[#allocation13_spill] sm:$0xff] %v3953_v31  ;;  %v1782_v48 = vmax.f32 %v1441_v6, %v1635_v4  ;;  %v1907_v16 = vmax.f32 %v1844_v43, %v1845_v37  ;;  %v3965_v22 = vpop.f32.mrb[106].mxu1 }
 0x1d1   :  { %v1442_v3 = vrot.slane %v1198_v63, 1  ;;  %v1636_v40 = vrot.slane %v1198_v63, 2 }
 0x1d2   :  { %v1846_v45 = vmax.f32 %v1188_v60, %v1782_v48  ;;  %v817_v50 = vpop.f32.mrb[94].mxu0  ;;  %v3960_v23 = vmax.f32 %v1843_v21, %v1907_v16  ;;  %v1239_v60 = vpop.f32.mrb[107].mxu1 }
 0x1d3   :  { %v1443_v38 = vsel %vm1350_vm1, %v1440_v41, %v1442_v3  ;;  %v1637_v12 = vsel %vm1544_vm2, %v1634_v27, %v1636_v40  ;;  %v1203_v61 = vadd.f32 %v3907_v19, %v817_v50  ;;  %v819_v28 = vpop.f32.mrb[95].mxu0 }
 0x1d4   :  { %4236 = vst [vmem:[#allocation14_spill] sm:$0xff] %v3960_v23  ;;  %v1783_v2 = vmax.f32 %v1443_v38, %v1637_v12  ;;  %v1908_v6 = vmax.f32 %v1845_v37, %v1846_v45  ;;  %v3974_v38 = vpop.f32.mrb[108].mxu1 }
 0x1d5   :  { %v1444_v4 = vrot.slane %v1203_v61, 1  ;;  %v1638_v36 = vrot.slane %v1203_v61, 2  ;;  %v1244_v31 = vpop.f32.mrb[109].mxu1 }
 0x1d6   :  { %v1847_v53 = vmax.f32 %v1193_v18, %v1783_v2  ;;  %v822_v21 = vpop.f32.mrb[96].mxu0  ;;  %v3969_v48 = vmax.f32 %v1844_v43, %v1908_v6 }
 0x1d7   :  { %v1445_v41 = vsel %vm1350_vm1, %v1442_v3, %v1444_v4  ;;  %v1639_v27 = vsel %vm1544_vm2, %v1636_v40, %v1638_v36  ;;  %v1208_v19 = vadd.f32 %v3914_v59, %v822_v21  ;;  %v824_v16 = vpop.f32.mrb[97].mxu0 }
 0x1d8   :  { %4237 = vst [vmem:[#allocation15_spill] sm:$0xff] %v3969_v48  ;;  %v1784_v50 = vmax.f32 %v1445_v41, %v1639_v27  ;;  %v1909_v12 = vmax.f32 %v1846_v45, %v1847_v53  ;;  %v3981_v6 = vpop.f32.mrb[110].mxu1 }
 0x1d9   :  { %v1446_v28 = vrot.slane %v1208_v19, 1  ;;  %v1640_v46 = vrot.slane %v1208_v19, 2 }
 0x1da   :  { %v1848_v23 = vmax.f32 %v1198_v63, %v1784_v50  ;;  %v827_v60 = vpop.f32.mrb[98].mxu0  ;;  %v3976_v18 = vmax.f32 %v1845_v37, %v1909_v12  ;;  %v1249_v63 = vpop.f32.mrb[111].mxu1 }
 0x1db   :  { %v1447_v43 = vsel %vm1350_vm1, %v1444_v4, %v1446_v28  ;;  %v1641_v3 = vsel %vm1544_vm2, %v1638_v36, %v1640_v46  ;;  %v1213_v40 = vadd.f32 %v3926_v11, %v827_v60  ;;  %v829_v2 = vpop.f32.mrb[99].mxu0 }
 0x1dc   :  { %4238 = vst [vmem:[#allocation16_spill] sm:$0xff] %v3976_v18  ;;  %v1785_v59 = vmax.f32 %v1447_v43, %v1641_v3  ;;  %v1910_v41 = vmax.f32 %v1847_v53, %v1848_v23  ;;  %v3990_v43 = vpop.f32.mrb[112].mxu1 }
 0x1dd   :  { %v1448_v27 = vrot.slane %v1213_v40, 1  ;;  %v1642_v31 = vrot.slane %v1213_v40, 2  ;;  %v1254_v48 = vpop.f32.mrb[113].mxu1 }
 0x1de   :  { %v1849_v16 = vmax.f32 %v1203_v61, %v1785_v59  ;;  %v832_v37 = vpop.f32.mrb[100].mxu0  ;;  %v3985_v50 = vmax.f32 %v1846_v45, %v1910_v41  ;;  %v2509_v45 = vmov 0  }
 0x1df   :  { %v1449_v4 = vsel %vm1350_vm1, %v1446_v28, %v1448_v27  ;;  %v1643_v36 = vsel %vm1544_vm2, %v1640_v46, %v1642_v31  ;;  %v1218_v11 = vadd.f32 %v3933_v29, %v832_v37  ;;  %v834_v12 = vpop.f32.mrb[101].mxu0  ;;  %2507 = vset.pattern.permute.xlu0 %v2509_v45  ;;  %v1998_v46 = vld [vmem:[%s4197_s3] sm:$0xff] }
 0x1e0   :  { %4239 = vst [vmem:[#allocation17_spill] sm:$0xff] %v3985_v50  ;;  %v1786_v60 = vmax.f32 %v1449_v4, %v1643_v36  ;;  %v1911_v3 = vmax.f32 %v1848_v23, %v1849_v16  ;;  %2001 = vperm.xlu0 %2507, %v1998_v46   ;;  %v4000_v48 = vpop.f32.mrb[114].mxu1 }
 0x1e1   :  { %v1450_v2 = vrot.slane %v1218_v11, 1  ;;  %v1644_v21 = vrot.slane %v1218_v11, 2  ;;  %v1259_v12 = vpop.f32.mrb[115].mxu1 }
 0x1e2   :  { %v837_v18 = vpop.f32.mrb[102].mxu0  ;;  %v1850_v63 = vmax.f32 %v1208_v19, %v1786_v60  ;;  %v3992_v61 = vmax.f32 %v1847_v53, %v1911_v3 }
 0x1e3   :  { %v1451_v29 = vsel %vm1350_vm1, %v1448_v27, %v1450_v2  ;;  %v1645_v28 = vsel %vm1544_vm2, %v1642_v31, %v1644_v21  ;;  %v1223_v59 = vadd.f32 %v3942_v9, %v837_v18  ;;  %v839_v41 = vpop.f32.mrb[103].mxu0 }
 0x1e4   :  { %4240 = vst [vmem:[#allocation18_spill] sm:$0xff] %v3992_v61  ;;  %v1787_v37 = vmax.f32 %v1451_v29, %v1645_v28  ;;  %v1912_v19 = vmax.f32 %v1849_v16, %v1850_v63  ;;  %v4009_v29 = vpop.f32.mrb[116].mxu1 }
 0x1e5   :  { %v1452_v4 = vrot.slane %v1223_v59, 1  ;;  %v1646_v36 = vrot.slane %v1223_v59, 2  ;;  %v1264_v50 = vpop.f32.mrb[117].mxu1 }
 0x1e6   :  { %v842_v60 = vpop.f32.mrb[104].mxu0  ;;  %v1851_v3 = vmax.f32 %v1213_v40, %v1787_v37  ;;  %v4004_v45 = vmax.f32 %v1848_v23, %v1912_v19 }
 0x1e7   :  { %v1453_v27 = vsel %vm1350_vm1, %v1450_v2, %v1452_v4  ;;  %v1647_v9 = vsel %vm1544_vm2, %v1644_v21, %v1646_v36  ;;  %v1228_v18 = vadd.f32 %v3949_v1, %v842_v60  ;;  %v844_v31 = vpop.f32.mrb[105].mxu0 }
 0x1e8   :  { %4241 = vst [vmem:[#allocation19_spill] sm:$0xff] %v4004_v45  ;;  %v1788_v46 = vmax.f32 %v1453_v27, %v1647_v9  ;;  %v1913_v28 = vmax.f32 %v1850_v63, %v1851_v3  ;;  %v4016_v37 = vpop.f32.mrb[118].mxu1 }
 0x1e9   :  { %v1454_v41 = vrot.slane %v1228_v18, 1  ;;  %v1648_v53 = vrot.slane %v1228_v18, 2  ;;  %v1269_v9 = vpop.f32.mrb[119].mxu1 }
 0x1ea   :  { %v847_v61 = vpop.f32.mrb[106].mxu0  ;;  %v1852_v12 = vmax.f32 %v1218_v11, %v1788_v46  ;;  %v4011_v44 = vmax.f32 %v1849_v16, %v1913_v28 }
 0x1eb   :  { %v1455_v23 = vsel %vm1350_vm1, %v1452_v4, %v1454_v41  ;;  %v1649_v40 = vsel %vm1544_vm2, %v1646_v36, %v1648_v53  ;;  %v1233_v21 = vadd.f32 %v3958_v10, %v847_v61  ;;  %v849_v2 = vpop.f32.mrb[107].mxu0 }
 0x1ec   :  { %4242 = vst [vmem:[#allocation20_spill] sm:$0xff] %v4011_v44  ;;  %v1789_v1 = vmax.f32 %v1455_v23, %v1649_v40  ;;  %v1914_v19 = vmax.f32 %v1851_v3, %v1852_v12  ;;  %v4025_v28 = vpop.f32.mrb[120].mxu1 }
 0x1ed   :  { %v1456_v27 = vrot.slane %v1233_v21, 1  ;;  %v1650_v50 = vrot.slane %v1233_v21, 2  ;;  %v1274_v60 = vpop.f32.mrb[121].mxu1 }
 0x1ee   :  { %v852_v11 = vpop.f32.mrb[108].mxu0  ;;  %v1853_v16 = vmax.f32 %v1223_v59, %v1789_v1  ;;  %v4020_v31 = vmax.f32 %v1850_v63, %v1914_v19 }
 0x1ef   :  { %v1457_v4 = vsel %vm1350_vm1, %v1454_v41, %v1456_v27  ;;  %v1651_v36 = vsel %vm1544_vm2, %v1648_v53, %v1650_v50  ;;  %v1238_v10 = vadd.f32 %v3965_v22, %v852_v11  ;;  %v854_v61 = vpop.f32.mrb[109].mxu0 }
 0x1f0   :  { %4243 = vst [vmem:[#allocation21_spill] sm:$0xff] %v4020_v31  ;;  %v1790_v46 = vmax.f32 %v1457_v4, %v1651_v36  ;;  %v1915_v23 = vmax.f32 %v1852_v12, %v1853_v16  ;;  %v4032_v19 = vpop.f32.mrb[122].mxu1 }
 0x1f1   :  { %v1458_v40 = vrot.slane %v1238_v10, 1  ;;  %v1652_v2 = vrot.slane %v1238_v10, 2  ;;  %v1279_v61 = vpop.f32.mrb[123].mxu1 }
 0x1f2   :  { %v857_v45 = vpop.f32.mrb[110].mxu0  ;;  %v4027_v9 = vmax.f32 %v1851_v3, %v1915_v23  ;;  %v1854_v59 = vmax.f32 %v1228_v18, %v1790_v46 }
 0x1f3   :  { %v1459_v63 = vsel %vm1350_vm1, %v1456_v27, %v1458_v40  ;;  %v1653_v41 = vsel %vm1544_vm2, %v1650_v50, %v1652_v2  ;;  %v1243_v53 = vadd.f32 %v3974_v38, %v857_v45  ;;  %v859_v1 = vpop.f32.mrb[111].mxu0 }
 0x1f4   :  { %4244 = vst [vmem:[#allocation22_spill] sm:$0xff] %v4027_v9  ;;  %v1791_v22 = vmax.f32 %v1459_v63, %v1653_v41  ;;  %v1916_v4 = vmax.f32 %v1853_v16, %v1854_v59  ;;  %v4041_v63 = vpop.f32.mrb[124].mxu1 }
 0x1f5   :  { %v1460_v36 = vrot.slane %v1243_v53, 1  ;;  %v1654_v60 = vrot.slane %v1243_v53, 2  ;;  %v1284_v44 = vpop.f32.mrb[125].mxu1 }
 0x1f6   :  { %v862_v3 = vpop.f32.mrb[112].mxu0  ;;  %v1855_v23 = vmax.f32 %v1233_v21, %v1791_v22  ;;  %v4036_v18 = vmax.f32 %v1852_v12, %v1916_v4 }
 0x1f7   :  { %v1461_v27 = vsel %vm1350_vm1, %v1458_v40, %v1460_v36  ;;  %v1655_v50 = vsel %vm1544_vm2, %v1652_v2, %v1654_v60  ;;  %v1248_v38 = vadd.f32 %v3981_v6, %v862_v3  ;;  %v864_v45 = vpop.f32.mrb[113].mxu0 }
 0x1f8   :  { %v1792_v46 = vmax.f32 %v1461_v27, %v1655_v50  ;;  %v1917_v41 = vmax.f32 %v1854_v59, %v1855_v23 }
 0x1f9   :  { %v1462_v1 = vrot.slane %v1248_v38, 1  ;;  %v1656_v11 = vrot.slane %v1248_v38, 2 }
 0x1fa   :  { %v867_v31 = vpop.f32.mrb[114].mxu0  ;;  %v4043_v61 = vmax.f32 %v1853_v16, %v1917_v41  ;;  %v1856_v21 = vmax.f32 %v1238_v10, %v1792_v46 }
 0x1fb   :  { %v1463_v12 = vsel %vm1350_vm1, %v1460_v36, %v1462_v1  ;;  %v1657_v40 = vsel %vm1544_vm2, %v1654_v60, %v1656_v11  ;;  %v1253_v2 = vadd.f32 %v3990_v43, %v867_v31  ;;  %v869_v22 = vpop.f32.mrb[115].mxu0 }
 0x1fc   :  { %v1793_v6 = vmax.f32 %v1463_v12, %v1657_v40  ;;  %v1918_v3 = vmax.f32 %v1855_v23, %v1856_v21 }
 0x1fd   :  { %v1464_v27 = vrot.slane %v1253_v2, 1  ;;  %v1658_v50 = vrot.slane %v1253_v2, 2 }
 0x1fe   :  { %v872_v45 = vpop.f32.mrb[116].mxu0  ;;  %v1857_v44 = vmax.f32 %v1243_v53, %v1793_v6  ;;  %v4050_v9 = vmax.f32 %v1854_v59, %v1918_v3 }
 0x1ff   :  { %v1465_v16 = vsel %vm1350_vm1, %v1462_v1, %v1464_v27  ;;  %v1659_v10 = vsel %vm1544_vm2, %v1656_v11, %v1658_v50  ;;  %v1258_v36 = vadd.f32 %v4000_v48, %v872_v45  ;;  %v874_v60 = vpop.f32.mrb[117].mxu0 }
 0x200   :  { %v1794_v43 = vmax.f32 %v1465_v16, %v1659_v10  ;;  %v1919_v31 = vmax.f32 %v1856_v21, %v1857_v44 }
 0x201   :  { %v1466_v46 = vrot.slane %v1258_v36, 1  ;;  %v1660_v41 = vrot.slane %v1258_v36, 2 }
 0x202   :  { %v877_v12 = vpop.f32.mrb[118].mxu0  ;;  %v4055_v40 = vmax.f32 %v1855_v23, %v1919_v31  ;;  %v1858_v22 = vmax.f32 %v1248_v38, %v1794_v43 }
 0x203   :  { %v1467_v4 = vsel %vm1350_vm1, %v1464_v27, %v1466_v46  ;;  %v1661_v59 = vsel %vm1544_vm2, %v1658_v50, %v1660_v41  ;;  %v1263_v53 = vadd.f32 %v4009_v29, %v877_v12  ;;  %v879_v1 = vpop.f32.mrb[119].mxu0 }
 0x204   :  { %v1795_v6 = vmax.f32 %v1467_v4, %v1661_v59  ;;  %v1920_v11 = vmax.f32 %v1857_v44, %v1858_v22 }
 0x205   :  { %v1468_v3 = vrot.slane %v1263_v53, 1  ;;  %v1662_v45 = vrot.slane %v1263_v53, 2 }
 0x206   :  { %v882_v16 = vpop.f32.mrb[120].mxu0  ;;  %v1859_v10 = vmax.f32 %v1253_v2, %v1795_v6  ;;  %v4062_v60 = vmax.f32 %v1856_v21, %v1920_v11 }
 0x207   :  { %v1469_v23 = vsel %vm1350_vm1, %v1466_v46, %v1468_v3  ;;  %v1663_v38 = vsel %vm1544_vm2, %v1660_v41, %v1662_v45  ;;  %v1268_v27 = vadd.f32 %v4016_v37, %v882_v16  ;;  %v884_v50 = vpop.f32.mrb[121].mxu0 }
 0x208   :  { %v1796_v29 = vmax.f32 %v1469_v23, %v1663_v38  ;;  %v1921_v43 = vmax.f32 %v1858_v22, %v1859_v10 }
 0x209   :  { %v1470_v4 = vrot.slane %v1268_v27, 1  ;;  %v1664_v31 = vrot.slane %v1268_v27, 2 }
 0x20a   :  { %v887_v12 = vpop.f32.mrb[122].mxu0  ;;  %v4067_v59 = vmax.f32 %v1857_v44, %v1921_v43  ;;  %v1860_v1 = vmax.f32 %v1258_v36, %v1796_v29 }
 0x20b   :  { %v1471_v48 = vsel %vm1350_vm1, %v1468_v3, %v1470_v4  ;;  %v1665_v21 = vsel %vm1544_vm2, %v1662_v45, %v1664_v31  ;;  %v1273_v2 = vadd.f32 %v4025_v28, %v887_v12  ;;  %v889_v46 = vpop.f32.mrb[123].mxu0 }
 0x20c   :  { %v1797_v6 = vmax.f32 %v1471_v48, %v1665_v21  ;;  %v1922_v41 = vmax.f32 %v1859_v10, %v1860_v1 }
 0x20d   :  { %v1472_v11 = vrot.slane %v1273_v2, 1  ;;  %v1666_v16 = vrot.slane %v1273_v2, 2 }
 0x20e   :  { %v892_v23 = vpop.f32.mrb[124].mxu0  ;;  %v1861_v38 = vmax.f32 %v1263_v53, %v1797_v6  ;;  %v4074_v50 = vmax.f32 %v1858_v22, %v1922_v41 }
 0x20f   :  { %v1473_v44 = vsel %vm1350_vm1, %v1470_v4, %v1472_v11  ;;  %v1667_v36 = vsel %vm1544_vm2, %v1664_v31, %v1666_v16  ;;  %v1278_v3 = vadd.f32 %v4032_v19, %v892_v23  ;;  %v894_v45 = vpop.f32.mrb[125].mxu0 }
 0x210   :  { %4245 = vst [vmem:[#allocation23_spill] sm:$0xff] %v4074_v50  ;;  %v1798_v28 = vmax.f32 %v1473_v44, %v1667_v36  ;;  %v1923_v29 = vmax.f32 %v1860_v1, %v1861_v38  ;;  %v4249_v50 = vmax.f32 %v3581_v42, %v3594_v56  ;;  %v4251_v56 = vpack.c.bf16 %v3649_v58, %v3636_v17 }
 0x211   :  { %v1474_v48 = vrot.slane %v1278_v3, 1  ;;  %v1668_v43 = vrot.slane %v1278_v3, 2  ;;  %v4256_v17 = vpack.c.bf16 %v3829_v15, %v3822_v57  ;;  %v4257_v58 = vpack.c.bf16 %v3707_v39, %v3700_v25  ;;  %v4264_v39 = vld [vmem:[#allocation3_spill] sm:$0xff] }
 0x212   :  { %v897_v12 = vpop.f32.mrb[126].mxu0  ;;  %v4079_v21 = vmax.f32 %v1859_v10, %v1923_v29  ;;  %v1862_v46 = vmax.f32 %v1268_v27, %v1798_v28  ;;  %v4273_v15 = vpack.c.bf16 %v4043_v61, %v4036_v18 }
 0x213   :  { %v1475_v37 = vsel %vm1350_vm1, %v1472_v11, %v1474_v48  ;;  %v1669_v22 = vsel %vm1544_vm2, %v1666_v16, %v1668_v43  ;;  %v1283_v53 = vadd.f32 %v4041_v63, %v897_v12  ;;  %v899_v4 = vpop.f32.mrb[127].mxu0 }
 0x214   :  { %4246 = vst [vmem:[#allocation24_spill] sm:$0xff] %v4079_v21  ;;  %v1799_v6 = vmax.f32 %v1475_v37, %v1669_v22  ;;  %v1924_v31 = vmax.f32 %v1861_v38, %v1862_v46  ;;  %v4247_v37 = vrot.slane %v3530_v5, 1  ;;  %v4248_v4 = vrot.slane %v3530_v5, 2 }
 0x215   :  { %v1476_v41 = vrot.slane %v1283_v53, 1  ;;  %v1670_v23 = vrot.slane %v1283_v53, 2 }
 0x216   :  { %v967_v44 = vpop.f32.mrb[0].mxu0  ;;  %v1863_v36 = vmax.f32 %v1273_v2, %v1799_v6  ;;  %v1988_v45 = vmax.f32 %v1860_v1, %v1924_v31 }
 0x217   :  { %v1477_v10 = vsel %vm1350_vm1, %v1474_v48, %v1476_v41  ;;  %v1671_v27 = vsel %vm1544_vm2, %v1668_v43, %v1670_v23  ;;  %v1351_v11 = vrot.slane %v967_v44, 1  ;;  %v1545_v28 = vrot.slane %v967_v44, 2  ;;  %v969_v16 = vpop.f32.mrb[1].mxu0 }
 0x218   :  { %v1800_v29 = vmax.f32 %v1477_v10, %v1671_v27  ;;  %v1925_v63 = vmax.f32 %v1862_v46, %v1863_v36 }
 0x219   :  { %v1353_v12 = vsel %vm1350_vm1, %v1351_v11, %v4247_v37  ;;  %v1543_v22 = vsel %vm1350_vm1, %v1476_v41, %v1351_v11  ;;  %v1547_v2 = vsel %vm1544_vm2, %v1545_v28, %v4248_v4  ;;  %v1737_v1 = vsel %vm1544_vm2, %v1670_v23, %v1545_v28 }
 0x21a   :  { %v1738_v48 = vmax.f32 %v1353_v12, %v1547_v2  ;;  %v1801_v6 = vmax.f32 %v1543_v22, %v1737_v1  ;;  %v1989_v43 = vmax.f32 %v1861_v38, %v1925_v63  ;;  %v1864_v31 = vmax.f32 %v1278_v3, %v1800_v29  ;;  %v4286_v29 = vld [vmem:[#allocation23_spill] sm:$0xff]  ;;  %v4288_v22 = vld [vmem:[#allocation14_spill] sm:$0xff]  ;;  %v4289_v2 = vld [vmem:[#allocation13_spill] sm:$0xff] }
 0x21b   :  { %v4250_v3 = vpack.c.bf16 %v3781_v34, %v3774_v49  ;;  %v4255_v49 = vpack.c.bf16 %v3691_v62, %v3684_v52  ;;  %v4260_v52 = vpack.c.bf16 %v3861_v51, %v3854_v30  ;;  %v4261_v62 = vpack.c.bf16 %v3739_v47, %v3732_v32  ;;  %v4262_v34 = vld [vmem:[#allocation4_spill] sm:$0xff]  ;;  %v1997_v32 = vld [vmem:[%s4196_s2 + $0x18] sm:$0xff]  ;;  %v4270_v47 = vld [vmem:[#allocation6_spill] sm:$0xff] }
 0x21c   :  { %v1802_v19 = vmax.f32 %v967_v44, %v1738_v48  ;;  %v1865_v16 = vmax.f32 %v1283_v53, %v1801_v6  ;;  %v2410_v10 = vpack.c.bf16 %v1989_v43, %v1988_v45  ;;  %v1926_v27 = vmax.f32 %v1863_v36, %v1864_v31  ;;  %v4283_v45 = vld [vmem:[#allocation11_spill] sm:$0xff]  ;;  %v4285_v61 = vld [vmem:[#allocation24_spill] sm:$0xff] }
 0x21d   :  { %v4263_v25 = vpack.c.bf16 %v3877_v54, %v4262_v34  ;;  %v4271_v54 = vld [vmem:[#allocation5_spill] sm:$0xff]  ;;  %v4277_v51 = vpack.c.bf16 %v4055_v40, %v4050_v9  ;;  %v4281_v44 = vpack.c.bf16 %v4067_v59, %v4062_v60  ;;  %v4287_v63 = vpack.c.bf16 %v4285_v61, %v4286_v29  ;;  %v4291_v40 = vld [vmem:[#allocation16_spill] sm:$0xff]  ;;  %v4292_v1 = vld [vmem:[#allocation15_spill] sm:$0xff] }
 0x21e   :  { %v1930_v37 = vmax.f32 %v1802_v19, %v4249_v50  ;;  %v1927_v21 = vmax.f32 %v1864_v31, %v1865_v16  ;;  %v1990_v41 = vmax.f32 %v1862_v46, %v1926_v27  ;;  %v1928_v11 = vmax.f32 %v1865_v16, %v1802_v19  ;;  %v4279_v46 = vld [vmem:[#allocation9_spill] sm:$0xff]  ;;  %v4294_v60 = vld [vmem:[#allocation18_spill] sm:$0xff]  ;;  %v4297_v43 = vld [vmem:[#allocation20_spill] sm:$0xff] }
 0x21f   :  { %v1929_v5 = vmax.f32 %v1802_v19, %v3581_v42  ;;  %v4252_v50 = vpack.c.bf16 %v3797_v0, %v3790_v33  ;;  %v4253_v42 = vpack.c.bf16 %v3675_v35, %v3664_v13  ;;  %v4258_v13 = vpack.c.bf16 %v3845_v14, %v3838_v24  ;;  %v4265_v33 = vld [vmem:[#allocation2_spill] sm:$0xff]  ;;  %v4274_v24 = vld [vmem:[#allocation8_spill] sm:$0xff]  ;;  %v4275_v14 = vld [vmem:[#allocation7_spill] sm:$0xff] }
 0x220   :  { %v2360_v4 = vpack.c.bf16 %v3622_v26, %v1930_v37  ;;  %v1991_v23 = vmax.f32 %v1863_v36, %v1927_v21  ;;  %v1992_v28 = vmax.f32 %v1864_v31, %v1928_v11  ;;  %v4254_v26 = vpack.c.bf16 %v3813_v8, %v3806_v20  ;;  %v4268_v20 = vld [vmem:[#allocation21_spill] sm:$0xff]  ;;  %v4278_v21 = vld [vmem:[#allocation10_spill] sm:$0xff]  ;;  %v4282_v36 = vld [vmem:[#allocation12_spill] sm:$0xff] }
 0x221   :  { %v1993_v12 = vmax.f32 %v1865_v16, %v1929_v5  ;;  %v4259_v35 = vpack.c.bf16 %v3723_v7, %v3716_v55  ;;  %v4266_v0 = vpack.c.bf16 %v4264_v39, %v4265_v33  ;;  %v1994_v55 = vld [vmem:[%s4196_s2] sm:$0xff]  ;;  %v4272_v57 = vpack.c.bf16 %v4270_v47, %v4271_v54  ;;  %v4295_v59 = vld [vmem:[#allocation17_spill] sm:$0xff]  ;;  %v4298_v31 = vld [vmem:[#allocation19_spill] sm:$0xff] }
 0x222   :  { %2361 = vmatpush3.bf16.msra.mxu1 %v2360_v4  ;;  %v2414_v38 = vpack.c.bf16 %v1991_v23, %v1990_v41  ;;  %v4267_v7 = vld [vmem:[#allocation22_spill] sm:$0xff]  ;;  %v4276_v30 = vpack.c.bf16 %v4274_v24, %v4275_v14  ;;  %v4280_v19 = vpack.c.bf16 %v4278_v21, %v4279_v46  ;;  %v4284_v18 = vpack.c.bf16 %v4282_v36, %v4283_v45  ;;  %v1996_v27 = vld [vmem:[%s4196_s2 + $0x10] sm:$0xff] }
 0x223   :  { %2363 = vmatprep.subr.bf16.mxu1 %v4250_v3  ;;  %v2418_v53 = vpack.c.bf16 %v1993_v12, %v1992_v28  ;;  %v4269_v8 = vpack.c.bf16 %v4267_v7, %v4268_v20  ;;  %v4290_v9 = vpack.c.bf16 %v4288_v22, %v4289_v2  ;;  %v4293_v48 = vpack.c.bf16 %v4291_v40, %v4292_v1 }
 0x224   :  { %v4296_v6 = vpack.c.bf16 %v4294_v60, %v4295_v59  ;;  %v4299_v16 = vpack.c.bf16 %v4297_v43, %v4298_v31 }
 0x226   :  { %2365 = vmatpush3.bf16.msra.mxu1 %v4251_v56 }
 0x227   :  { %2367 = vmatprep.subr.bf16.mxu1 %v4252_v50 }
 0x22a   :  { %2369 = vmatpush3.bf16.msra.mxu1 %v4253_v42 }
 0x22b   :  { %2371 = vmatprep.subr.bf16.mxu1 %v4254_v26 }
 0x22e   :  { %2373 = vmatpush3.bf16.msra.mxu1 %v4255_v49 }
 0x22f   :  { %2375 = vmatprep.subr.bf16.mxu1 %v4256_v17 }
 0x232   :  { %2377 = vmatpush3.bf16.msra.mxu1 %v4257_v58 }
 0x233   :  { %2379 = vmatprep.subr.bf16.mxu1 %v4258_v13 }
 0x236   :  { %2381 = vmatpush3.bf16.msra.mxu1 %v4259_v35 }
 0x237   :  { %2383 = vmatprep.subr.bf16.mxu1 %v4260_v52 }
 0x23a   :  { %2385 = vmatpush3.bf16.msra.mxu1 %v4261_v62 }
 0x23b   :  { %2387 = vmatprep.subr.bf16.mxu1 %v4263_v25 }
 0x23e   :  { %2389 = vmatpush3.bf16.msra.mxu1 %v4266_v0 }
 0x23f   :  { %2391 = vmatprep.subr.bf16.mxu1 %v4269_v8 }
 0x241   :  { %2069 = vmatmul.mubr.f32.vlgmr.msra.gmra.mrb[126].mxu1 %v1994_v55 }
 0x242   :  { %2393 = vmatpush3.bf16.msra.mxu1 %v4272_v57  ;;  %2138 = vmatprep.mubr.f32.mxu1 %v1997_v32 }
 0x243   :  { %2395 = vmatprep.subr.bf16.mxu1 %v4273_v15 }
 0x246   :  { %2397 = vmatpush3.bf16.msra.mxu1 %v4276_v30 }
 0x247   :  { %2399 = vmatprep.subr.bf16.mxu1 %v4277_v51 }
 0x24a   :  { %2401 = vmatpush3.bf16.msra.mxu1 %v4280_v19 }
 0x24b   :  { %2403 = vmatprep.subr.bf16.mxu1 %v4281_v44 }
 0x24e   :  { %2405 = vmatpush3.bf16.msra.mxu1 %v4284_v18 }
 0x24f   :  { %2407 = vmatprep.subr.bf16.mxu1 %v4287_v63 }
 0x252   :  { %2409 = vmatpush3.bf16.msra.mxu1 %v4290_v9 }
 0x253   :  { %2411 = vmatprep.subr.bf16.mxu1 %v2410_v10 }
 0x256   :  { %2413 = vmatpush3.bf16.msra.mxu1 %v4293_v48 }
 0x257   :  { %2415 = vmatprep.subr.bf16.mxu1 %v2414_v38 }
 0x25a   :  { %2417 = vmatpush3.bf16.msra.mxu1 %v4296_v6 }
 0x25b   :  { %2419 = vmatprep.subr.bf16.mxu1 %v2418_v53 }
 0x25e   :  { %2421 = vmatpush3.bf16.msra.mxu1 %v4299_v16 }
 0x25f   :  { %v2002_v11 = vpop.permute.xlu0 %2001 }
 0x261   :  { %2139 = vmatmul.mubr.f32.vlgmr.msra.gmra.mrb[128].mxu1 %v1996_v27 }
 0x314   :  { %v2245_v10 = vpop.f32.mrb[126].mxu1 }
 0x315   :  { %v2246_v37 = vpop.f32.mrb[127].mxu1 }
 0x316   :  { %v2247_v41 = vadd.f32 %v2246_v37, %v2245_v10 }
 0x318   :  { %v2071_v23 = vadd.f32 %v2247_v41, %v2002_v11 }
 0x334   :  { %v2280_v5 = vpop.f32.mrb[128].mxu1 }
 0x335   :  { %v2281_v4 = vpop.f32.mrb[129].mxu1 }
 0x336   :  { %v2282_v28 = vadd.f32 %v2281_v4, %v2280_v5 }
 0x338   :  { %v2141_v12 = vadd.f32 %v2282_v28, %v2071_v23 }
 0x33a   :  { %2144 = vst [vmem:[%s4198_s4] sm:$0xff] %v2141_v12 }

</bundles_post_ra>
